<compile_context>
chip_gen: v6e
topology: v6e:2x2x1
jax: 0.10.0
libtpu: 0.0.40
codegen_flags: <defaults>
</compile_context>

<pallas_src>
import jax
import jax.numpy as jnp
from jax import lax
from jax.experimental import pallas as pl
from jax.experimental.pallas import tpu as pltpu


def _round_up(n, m):
    return ((n + m - 1) // m) * m


def autoencoder_kernel(x_ref,
                       w1_ref, b1_ref,   # encoder Linear(bert_dim -> 512)
                       w2_ref, b2_ref,   # encoder Linear(512 -> latent_p)
                       w3_ref, b3_ref,   # decoder Linear(latent_p -> 512)
                       w4_ref, b4_ref,   # decoder Linear(512 -> bert_dim)
                       xrec_ref, z_ref):
    # x tile: [block_b, bert_dim] bf16 (cast in the wrapper -> half HBM traffic).
    x = x_ref[...]

    # ---- encoder ---- (bf16 operands on the MXU, f32 accumulation)
    h1 = jnp.dot(x, w1_ref[...], preferred_element_type=jnp.float32) + b1_ref[...]
    h1 = jnp.maximum(h1, 0.0)                                           # ReLU (f32, VPU)
    z = jnp.dot(h1.astype(jnp.bfloat16), w2_ref[...],
                preferred_element_type=jnp.float32) + b2_ref[...]

    # ---- F.normalize(z, dim=-1)  (p=2, eps=1e-12): z / max(||z||_2, eps) ----
    # rsqrt on the EUP + multiply on the VPU; clamp at eps^2 == 1e-24.
    # Padded latent lanes are exactly 0, so they do not perturb the norm.
    sumsq = jnp.sum(z * z, axis=-1, keepdims=True)
    z = z * lax.rsqrt(jnp.maximum(sumsq, 1e-24))
    z_ref[...] = z.astype(z_ref.dtype)                                  # lane-dense store (128)

    # ---- decoder ----
    h2 = jnp.dot(z.astype(jnp.bfloat16), w3_ref[...],
                 preferred_element_type=jnp.float32) + b3_ref[...]
    h2 = jnp.maximum(h2, 0.0)                                           # ReLU
    x_rec = jnp.dot(h2.astype(jnp.bfloat16), w4_ref[...],
                    preferred_element_type=jnp.float32) + b4_ref[...]
    xrec_ref[...] = x_rec.astype(xrec_ref.dtype)


def autoencoder_forward(x, prepared, *, block_b=None):
    """x: [B, bert_dim] float32.  Returns (x_rec [B, bert_dim] f32, z [B, latent_dim] f32)."""
    params, latent_dim = prepared
    w1, b1, w2, b2, w3, b3, w4, b4 = params
    B, bert_dim = x.shape
    hidden = w1.shape[1]
    latent_p = w2.shape[1]          # latent padded to a multiple of 128

    # --- batch tiling: 128-aligned tile (MXU M-dim), <= 512 rows by default so the
    #     per-tile working set fits the scoped-VMEM defaults on v5e/v6e/v7x and the
    #     grid has many steps for pipelining / megacore sharding on large batches.
    if block_b is None:
        block_b = min(512, _round_up(B, 128))
    block_b = _round_up(block_b, 128)
    Bp = _round_up(B, block_b)
    if Bp != B:
        x = jnp.pad(x, ((0, Bp - B), (0, 0)))   # padded rows are sliced off below
    x_in = x.astype(jnp.bfloat16)

    grid = (Bp // block_b,)
    x_spec = pl.BlockSpec((block_b, bert_dim), lambda i: (i, 0))
    # Weights/biases use a constant block index -> Pallas keeps them resident and
    # does not re-DMA them across grid steps.
    rep = lambda r, c: pl.BlockSpec((r, c), lambda i: (0, 0))

    out_shapes = (
        jax.ShapeDtypeStruct((Bp, bert_dim), jnp.float32),   # x_rec
        jax.ShapeDtypeStruct((Bp, latent_p), jnp.float32),   # z (lane-padded)
    )
    out_specs = (
        pl.BlockSpec((block_b, bert_dim), lambda i: (i, 0)),
        pl.BlockSpec((block_b, latent_p), lambda i: (i, 0)),
    )

    flops = 2 * Bp * (bert_dim * hidden + hidden * latent_p
                      + latent_p * hidden + hidden * bert_dim)
    param_bytes = sum(int(p.size) * p.dtype.itemsize
                      for p in (w1, b1, w2, b2, w3, b3, w4, b4))
    bytes_accessed = (int(x_in.size) * 2            # bf16 input
                      + Bp * bert_dim * 4           # f32 x_rec
                      + Bp * latent_p * 4           # f32 z
                      + param_bytes)
    cost = pl.CostEstimate(flops=flops, transcendentals=Bp,
                           bytes_accessed=bytes_accessed)

    x_rec, z = pl.pallas_call(
        autoencoder_kernel,
        out_shape=out_shapes,
        grid_spec=pltpu.PrefetchScalarGridSpec(
            num_scalar_prefetch=0,
            grid=grid,
            in_specs=[
                x_spec,
                rep(bert_dim, hidden), rep(1, hidden),
                rep(hidden, latent_p), rep(1, latent_p),
                rep(latent_p, hidden), rep(1, hidden),
                rep(hidden, bert_dim), rep(1, bert_dim),
            ],
            out_specs=out_specs,
        ),
        compiler_params=pltpu.CompilerParams(
            dimension_semantics=("parallel",)),
        cost_estimate=cost,
    )(x_in, w1, b1, w2, b2, w3, b3, w4, b4)

    return x_rec[:B], z[:B, :latent_dim]


def init_params(key, bert_dim, latent_dim, hidden=512):
    """f32 params mimicking PyTorch Linear default init (U[-1/sqrt(fan_in), +]).
    Weights are stored already transposed to [in, out]."""
    def linear(k, fan_in, fan_out):
        kw, kb = jax.random.split(k)
        bound = 1.0 / jnp.sqrt(fan_in)
        w = jax.random.uniform(kw, (fan_in, fan_out), jnp.float32, -bound, bound)
        b = jax.random.uniform(kb, (1, fan_out), jnp.float32, -bound, bound)
        return w, b

    k1, k2, k3, k4 = jax.random.split(key, 4)
    w1, b1 = linear(k1, bert_dim, hidden)     # encoder[0]
    w2, b2 = linear(k2, hidden, latent_dim)   # encoder[2]
    w3, b3 = linear(k3, latent_dim, hidden)   # decoder[0]
    w4, b4 = linear(k4, hidden, bert_dim)     # decoder[2]
    return (w1, b1, w2, b2, w3, b3, w4, b4)


def prepare_params(params, latent_dim):
    """Zero-pad the latent axis to a multiple of 128 (lane-dense z / dots) and cast
    weights to bf16 for the MXU.  Biases stay f32 (added after f32 accumulation)."""
    w1, b1, w2, b2, w3, b3, w4, b4 = params
    latent_p = _round_up(latent_dim, 128)
    pad = latent_p - latent_dim
    if pad:
        w2 = jnp.pad(w2, ((0, 0), (0, pad)))
        b2 = jnp.pad(b2, ((0, 0), (0, pad)))
        w3 = jnp.pad(w3, ((0, pad), (0, 0)))
    prepared = (w1.astype(jnp.bfloat16), b1,
                w2.astype(jnp.bfloat16), b2,
                w3.astype(jnp.bfloat16), b3,
                w4.astype(jnp.bfloat16), b4)
    return prepared, latent_dim


def reference_forward(x, params):
    """Pure-JAX f32 reference matching the PyTorch module semantics exactly."""
    w1, b1, w2, b2, w3, b3, w4, b4 = params
    h = jnp.maximum(x @ w1 + b1, 0.0)
    z = h @ w2 + b2
    z = z / jnp.maximum(jnp.sqrt(jnp.sum(z * z, axis=-1, keepdims=True)), 1e-12)
    h2 = jnp.maximum(z @ w3 + b3, 0.0)
    x_rec = h2 @ w4 + b4
    return x_rec, z


def reference_forward_matched(x, prepared):
    """Matched-precision reference (bf16 matmul operands, f32 accumulation)."""
    (w1, b1, w2, b2, w3, b3, w4, b4), latent_dim = prepared
    dot = lambda a, b: jnp.dot(a.astype(jnp.bfloat16), b,
                               preferred_element_type=jnp.float32)
    h = jnp.maximum(dot(x, w1) + b1, 0.0)
    z = dot(h, w2) + b2
    z = z * lax.rsqrt(jnp.maximum(jnp.sum(z * z, axis=-1, keepdims=True), 1e-24))
    h2 = jnp.maximum(dot(z, w3) + b3, 0.0)
    x_rec = dot(h2, w4) + b4
    return x_rec, z[:, :latent_dim]


if __name__ == "__main__":
    # Small, TPU-friendly config: bert_dim=256, latent_dim=64, batch=8.
    BATCH, BERT_DIM, LATENT_DIM = 8, 256, 64

    key = jax.random.PRNGKey(0)
    k_params, k_x = jax.random.split(key)
    params_f32 = init_params(k_params, BERT_DIM, LATENT_DIM)
    prepared = prepare_params(params_f32, LATENT_DIM)
    x = jax.random.normal(k_x, (BATCH, BERT_DIM), jnp.float32)

    x_rec, z = autoencoder_forward(x, prepared)
    jax.block_until_ready((x_rec, z))

    assert x_rec.shape == (BATCH, BERT_DIM) and z.shape == (BATCH, LATENT_DIM)

    # Matched-precision (bf16-matmul) reference: tight check of the kernel itself.
    xr_m, z_m = reference_forward_matched(x, prepared)
    assert jnp.allclose(x_rec, xr_m, atol=5e-3, rtol=5e-3), "x_rec mismatch vs matched-precision ref"
    assert jnp.allclose(z, z_m, atol=5e-3, rtol=5e-3), "z mismatch vs matched-precision ref"

    # Full-f32 reference: loose check (bf16 matmul operands, f32 accumulation).
    xr_f, z_f = reference_forward(x, params_f32)
    assert jnp.allclose(x_rec, xr_f, atol=5e-2, rtol=5e-2), "x_rec mismatch vs f32 ref"
    assert jnp.allclose(z, z_f, atol=2e-2, rtol=5e-2), "z mismatch vs f32 ref"

    print("KERNEL_OK")
</pallas_src>

<mosaic_0001>
module attributes {stable_mosaic.version = 11 : i64} {
  func.func @autoencoder_kernel(%arg0: i32, %arg1: memref<128x256xbf16, #tpu.memory_space<vmem>>, %arg2: memref<256x512xbf16, #tpu.memory_space<vmem>>, %arg3: memref<1x512xf32, #tpu.memory_space<vmem>>, %arg4: memref<512x128xbf16, #tpu.memory_space<vmem>>, %arg5: memref<1x128xf32, #tpu.memory_space<vmem>>, %arg6: memref<128x512xbf16, #tpu.memory_space<vmem>>, %arg7: memref<1x512xf32, #tpu.memory_space<vmem>>, %arg8: memref<512x256xbf16, #tpu.memory_space<vmem>>, %arg9: memref<1x256xf32, #tpu.memory_space<vmem>>, %arg10: memref<128x256xf32, #tpu.memory_space<vmem>>, %arg11: memref<128x128xf32, #tpu.memory_space<vmem>>) attributes {dimension_semantics = [#tpu.dimension_semantics<parallel>], iteration_bounds = array<i64: 1>, scalar_prefetch = 0 : i64, scratch_operands = 0 : i64, tpu.core_type = #tpu.core_type<tc>, window_params = [{transform_indices = @transform_0, window_bounds = array<i64: 128, 256>}, {pipeline_mode = #tpu.pipeline_mode<synchronous>, transform_indices = @transform_1, window_bounds = array<i64: 256, 512>}, {pipeline_mode = #tpu.pipeline_mode<synchronous>, transform_indices = @transform_2, window_bounds = array<i64: 1, 512>}, {pipeline_mode = #tpu.pipeline_mode<synchronous>, transform_indices = @transform_3, window_bounds = array<i64: 512, 128>}, {pipeline_mode = #tpu.pipeline_mode<synchronous>, transform_indices = @transform_4, window_bounds = array<i64: 1, 128>}, {pipeline_mode = #tpu.pipeline_mode<synchronous>, transform_indices = @transform_5, window_bounds = array<i64: 128, 512>}, {pipeline_mode = #tpu.pipeline_mode<synchronous>, transform_indices = @transform_6, window_bounds = array<i64: 1, 512>}, {pipeline_mode = #tpu.pipeline_mode<synchronous>, transform_indices = @transform_7, window_bounds = array<i64: 512, 256>}, {pipeline_mode = #tpu.pipeline_mode<synchronous>, transform_indices = @transform_8, window_bounds = array<i64: 1, 256>}, {transform_indices = @transform_9, window_bounds = array<i64: 128, 256>}, {transform_indices = @transform_10, window_bounds = array<i64: 128, 128>}]} {
    %c0 = arith.constant 0 : index
    %c0_0 = arith.constant 0 : index
    %0 = vector.load %arg1[%c0, %c0_0] : memref<128x256xbf16, #tpu.memory_space<vmem>>, vector<128x256xbf16>
    %c0_1 = arith.constant 0 : index
    %c0_2 = arith.constant 0 : index
    %1 = vector.load %arg2[%c0_1, %c0_2] : memref<256x512xbf16, #tpu.memory_space<vmem>>, vector<256x512xbf16>
    %cst = arith.constant dense<0.000000e+00> : vector<128x512xf32>
    %2 = tpu.matmul %0, %1, %cst {dimension_numbers = #tpu.dot_dimension_numbers<[1], [0], [0], [1], [0, 0, 1, 1], [], []>} : vector<128x256xbf16>, vector<256x512xbf16>, vector<128x512xf32> -> vector<128x512xf32>
    %c0_3 = arith.constant 0 : index
    %c0_4 = arith.constant 0 : index
    %3 = vector.load %arg3[%c0_3, %c0_4] : memref<1x512xf32, #tpu.memory_space<vmem>>, vector<1x512xf32>
    %4 = vector.broadcast %3 : vector<1x512xf32> to vector<128x512xf32>
    %5 = arith.addf %2, %4 : vector<128x512xf32>
    %cst_5 = arith.constant 0.000000e+00 : f32
    %6 = vector.broadcast %cst_5 : f32 to vector<128x512xf32>
    %7 = arith.maximumf %5, %6 : vector<128x512xf32>
    %8 = arith.truncf %7 : vector<128x512xf32> to vector<128x512xbf16>
    %c0_6 = arith.constant 0 : index
    %c0_7 = arith.constant 0 : index
    %9 = vector.load %arg4[%c0_6, %c0_7] : memref<512x128xbf16, #tpu.memory_space<vmem>>, vector<512x128xbf16>
    %cst_8 = arith.constant dense<0.000000e+00> : vector<128x128xf32>
    %10 = tpu.matmul %8, %9, %cst_8 {dimension_numbers = #tpu.dot_dimension_numbers<[1], [0], [0], [1], [0, 0, 1, 1], [], []>} : vector<128x512xbf16>, vector<512x128xbf16>, vector<128x128xf32> -> vector<128x128xf32>
    %c0_9 = arith.constant 0 : index
    %c0_10 = arith.constant 0 : index
    %11 = vector.load %arg5[%c0_9, %c0_10] : memref<1x128xf32, #tpu.memory_space<vmem>>, vector<1x128xf32>
    %12 = vector.broadcast %11 : vector<1x128xf32> to vector<128x128xf32>
    %13 = arith.addf %10, %12 : vector<128x128xf32>
    %14 = arith.mulf %13, %13 : vector<128x128xf32>
    %cst_11 = arith.constant dense<0.000000e+00> : vector<128xf32>
    %15 = vector.multi_reduction <add>, %14, %cst_11 [1] : vector<128x128xf32> to vector<128xf32>
    %16 = vector.shape_cast %15 : vector<128xf32> to vector<128x1xf32>
    %cst_12 = arith.constant 1.000000e-24 : f32
    %17 = vector.broadcast %cst_12 : f32 to vector<128x1xf32>
    %18 = arith.maximumf %16, %17 : vector<128x1xf32>
    %19 = math.rsqrt %18 : vector<128x1xf32>
    %20 = vector.broadcast %19 : vector<128x1xf32> to vector<128x128xf32>
    %21 = arith.mulf %13, %20 : vector<128x128xf32>
    %c0_13 = arith.constant 0 : index
    %c0_14 = arith.constant 0 : index
    %22 = vector.load %arg11[%c0_13, %c0_14] : memref<128x128xf32, #tpu.memory_space<vmem>>, vector<128x128xf32>
    tpu.vector_store %arg11[%c0_13, %c0_14], %21 {strides = array<i32>} : memref<128x128xf32, #tpu.memory_space<vmem>>, vector<128x128xf32>,
    %23 = arith.truncf %21 : vector<128x128xf32> to vector<128x128xbf16>
    %c0_15 = arith.constant 0 : index
    %c0_16 = arith.constant 0 : index
    %24 = vector.load %arg6[%c0_15, %c0_16] : memref<128x512xbf16, #tpu.memory_space<vmem>>, vector<128x512xbf16>
    %cst_17 = arith.constant dense<0.000000e+00> : vector<128x512xf32>
    %25 = tpu.matmul %23, %24, %cst_17 {dimension_numbers = #tpu.dot_dimension_numbers<[1], [0], [0], [1], [0, 0, 1, 1], [], []>} : vector<128x128xbf16>, vector<128x512xbf16>, vector<128x512xf32> -> vector<128x512xf32>
    %c0_18 = arith.constant 0 : index
    %c0_19 = arith.constant 0 : index
    %26 = vector.load %arg7[%c0_18, %c0_19] : memref<1x512xf32, #tpu.memory_space<vmem>>, vector<1x512xf32>
    %27 = vector.broadcast %26 : vector<1x512xf32> to vector<128x512xf32>
    %28 = arith.addf %25, %27 : vector<128x512xf32>
    %cst_20 = arith.constant 0.000000e+00 : f32
    %29 = vector.broadcast %cst_20 : f32 to vector<128x512xf32>
    %30 = arith.maximumf %28, %29 : vector<128x512xf32>
    %31 = arith.truncf %30 : vector<128x512xf32> to vector<128x512xbf16>
    %c0_21 = arith.constant 0 : index
    %c0_22 = arith.constant 0 : index
    %32 = vector.load %arg8[%c0_21, %c0_22] : memref<512x256xbf16, #tpu.memory_space<vmem>>, vector<512x256xbf16>
    %cst_23 = arith.constant dense<0.000000e+00> : vector<128x256xf32>
    %33 = tpu.matmul %31, %32, %cst_23 {dimension_numbers = #tpu.dot_dimension_numbers<[1], [0], [0], [1], [0, 0, 1, 1], [], []>} : vector<128x512xbf16>, vector<512x256xbf16>, vector<128x256xf32> -> vector<128x256xf32>
    %c0_24 = arith.constant 0 : index
    %c0_25 = arith.constant 0 : index
    %34 = vector.load %arg9[%c0_24, %c0_25] : memref<1x256xf32, #tpu.memory_space<vmem>>, vector<1x256xf32>
    %35 = vector.broadcast %34 : vector<1x256xf32> to vector<128x256xf32>
    %36 = arith.addf %33, %35 : vector<128x256xf32>
    %c0_26 = arith.constant 0 : index
    %c0_27 = arith.constant 0 : index
    %37 = vector.load %arg10[%c0_26, %c0_27] : memref<128x256xf32, #tpu.memory_space<vmem>>, vector<128x256xf32>
    tpu.vector_store %arg10[%c0_26, %c0_27], %36 {strides = array<i32>} : memref<128x256xf32, #tpu.memory_space<vmem>>, vector<128x256xf32>,
    return
  }
  func.func @transform_0(%arg0: i32) -> (i32, i32) {
    %c0_i32 = arith.constant 0 : i32
    %c0_i32_0 = arith.constant 0 : i32
    return %arg0, %c0_i32 : i32, i32
  }
  func.func @transform_1(%arg0: i32) -> (i32, i32) {
    %c0_i32 = arith.constant 0 : i32
    %c0_i32_0 = arith.constant 0 : i32
    %c0_i32_1 = arith.constant 0 : i32
    return %c0_i32, %c0_i32_0 : i32, i32
  }
  func.func @transform_2(%arg0: i32) -> (i32, i32) {
    %c0_i32 = arith.constant 0 : i32
    %c0_i32_0 = arith.constant 0 : i32
    %c0_i32_1 = arith.constant 0 : i32
    return %c0_i32, %c0_i32_0 : i32, i32
  }
  func.func @transform_3(%arg0: i32) -> (i32, i32) {
    %c0_i32 = arith.constant 0 : i32
    %c0_i32_0 = arith.constant 0 : i32
    %c0_i32_1 = arith.constant 0 : i32
    return %c0_i32, %c0_i32_0 : i32, i32
  }
  func.func @transform_4(%arg0: i32) -> (i32, i32) {
    %c0_i32 = arith.constant 0 : i32
    %c0_i32_0 = arith.constant 0 : i32
    %c0_i32_1 = arith.constant 0 : i32
    return %c0_i32, %c0_i32_0 : i32, i32
  }
  func.func @transform_5(%arg0: i32) -> (i32, i32) {
    %c0_i32 = arith.constant 0 : i32
    %c0_i32_0 = arith.constant 0 : i32
    %c0_i32_1 = arith.constant 0 : i32
    return %c0_i32, %c0_i32_0 : i32, i32
  }
  func.func @transform_6(%arg0: i32) -> (i32, i32) {
    %c0_i32 = arith.constant 0 : i32
    %c0_i32_0 = arith.constant 0 : i32
    %c0_i32_1 = arith.constant 0 : i32
    return %c0_i32, %c0_i32_0 : i32, i32
  }
  func.func @transform_7(%arg0: i32) -> (i32, i32) {
    %c0_i32 = arith.constant 0 : i32
    %c0_i32_0 = arith.constant 0 : i32
    %c0_i32_1 = arith.constant 0 : i32
    return %c0_i32, %c0_i32_0 : i32, i32
  }
  func.func @transform_8(%arg0: i32) -> (i32, i32) {
    %c0_i32 = arith.constant 0 : i32
    %c0_i32_0 = arith.constant 0 : i32
    %c0_i32_1 = arith.constant 0 : i32
    return %c0_i32, %c0_i32_0 : i32, i32
  }
  func.func @transform_9(%arg0: i32) -> (i32, i32) {
    %c0_i32 = arith.constant 0 : i32
    %c0_i32_0 = arith.constant 0 : i32
    return %arg0, %c0_i32 : i32, i32
  }
  func.func @transform_10(%arg0: i32) -> (i32, i32) {
    %c0_i32 = arith.constant 0 : i32
    %c0_i32_0 = arith.constant 0 : i32
    return %arg0, %c0_i32 : i32, i32
  }
}

</mosaic_0001>

<bundles_post_ra>
// kernel: tpu_custom_call.1
= control target key start
LH: loop header
LB: loop body
LE: loop exit
PB: predicated region body
PF: predicated region fallthrough
CT: control target
= control target key end

     0   :  { %16 = vsyncpa [#allocation3], 0  ;;  %s4035_s0 = inlined_call_operand.hbm [shape: bf16[128,256], index: 0, kind: input, shape index: {}]   ;;  %s4036_s1 = inlined_call_operand.hbm [shape: bf16[256,512], index: 1, kind: input, shape index: {}]   ;;  %s4037_s2 = inlined_call_operand.hbm [shape: f32[1,512], index: 2, kind: input, shape index: {}]   ;;  %s4038_s3 = inlined_call_operand.hbm [shape: bf16[512,128], index: 3, kind: input, shape index: {}]   ;;  %s4039_s4 = inlined_call_operand.vmem [shape: f32[1,128], index: 4, kind: input, shape index: {}]   ;;  %s4040_s5 = inlined_call_operand.hbm [shape: bf16[128,512], index: 5, kind: input, shape index: {}]   ;;  %s4041_s6 = inlined_call_operand.vmem [shape: f32[1,512], index: 6, kind: input, shape index: {}]   ;;  %s4042_s7 = inlined_call_operand.hbm [shape: bf16[512,256], index: 7, kind: input, shape index: {}]   ;;  %s4043_s8 = inlined_call_operand.vmem [shape: f32[1,256], index: 8, kind: input, shape index: {}]   ;;  %s4044_s9 = inlined_call_operand.hbm [shape: f32[128,256], index: 9, kind: output, shape index: {0}]   ;;  %s4045_s10 = inlined_call_operand.hbm [shape: f32[128,128], index: 10, kind: output, shape index: {1}]  }
   0x1   :  { %17 = vsyncpa [#allocation6], 0 }
   0x2   :  { %18 = vsyncpa [#allocation9], 0 }
   0x3   :  { %19 = vsyncpa [#allocation12], 0 }
   0x4   :  { %20 = vsyncpa [#allocation4], 0 }
   0x5   :  { %21 = vsyncpa [#allocation15], 0  ;;  %s3596_s13 = smov [#allocation5]  }
   0x6   :  { %s39_s14 = sshll.u32 %s3596_s13, 4  ;;  %s40_s14 = int_to_ptr.vmem [resolvable:$true] %s39_s14 }
   0x7   :  { %s3432_s15 = scalar_lea.vmem %s40_s14, 8192  ;;  %p3437_p1 = scmp.lt.s32.totalorder %s40_s14, %s40_s14 }
   0x8   :  { %p3433_p0 = scmp.ne.s32.totalorder %s40_s14, %s3432_s15  ;;  %p3438_p2 = scmp.lt.s32.totalorder %s3432_s15, %s3432_s15 }
   0xa   :  { %p3439_p3 = por %p3438_p2, %p3437_p1 }
   0xc   :  { %p3440_p4 = pnand %p3439_p3, %p3433_p0 }
   0xe   :  { %3443 = shalt.err (!%p3440_p4)
}
   0xf   :  { %s3597_s16 = smov 256   ;;  %s3598_s17 = smov 16  }
  0x10   :  { %45 = dma.hbm_to_vmem [thread:$0]  %s4036_s1, 8192, %s40_s14, [#allocation6], %s3597_s16, %s3597_s16, %s3598_s17  }
  0x11   :  { %s3599_s20 = smov [#allocation8]  }
  0x12   :  { %s61_s21 = sshll.u32 %s3599_s20, 4  ;;  %s62_s21 = int_to_ptr.vmem [resolvable:$true] %s61_s21 }
  0x13   :  { %s3452_s22 = scalar_lea.vmem %s62_s21, 4096  ;;  %p3457_p6 = scmp.lt.s32.totalorder %s62_s21, %s62_s21 }
  0x14   :  { %p3453_p5 = scmp.ne.s32.totalorder %s62_s21, %s3452_s22  ;;  %p3458_p7 = scmp.lt.s32.totalorder %s3452_s22, %s3452_s22 }
  0x16   :  { %p3459_p8 = por %p3458_p7, %p3457_p6 }
  0x18   :  { %p3460_p9 = pnand %p3459_p8, %p3453_p5 }
  0x1a   :  { %3463 = shalt.err (!%p3460_p9)
}
  0x1b   :  { %s3600_s23 = smov 64   ;;  %s3601_s24 = smov 4  }
  0x1c   :  { %67 = dma.hbm_to_vmem [thread:$0]  %s4038_s3, 4096, %s62_s21, [#allocation9], %s3600_s23, %s3600_s23, %s3601_s24  }
  0x1d   :  { %s3602_s27 = smov [#allocation2]  }
  0x1e   :  { %s27_s28 = sshll.u32 %s3602_s27, 4  ;;  %s28_s28 = int_to_ptr.vmem [resolvable:$true] %s27_s28 }
  0x1f   :  { %s3472_s1 = scalar_lea.vmem %s28_s28, 2048  ;;  %p3477_p11 = scmp.lt.s32.totalorder %s28_s28, %s28_s28 }
  0x20   :  { %p3473_p10 = scmp.ne.s32.totalorder %s28_s28, %s3472_s1  ;;  %p3478_p12 = scmp.lt.s32.totalorder %s3472_s1, %s3472_s1 }
  0x22   :  { %p3479_p13 = por %p3478_p12, %p3477_p11 }
  0x24   :  { %p3480_p0 = pnand %p3479_p13, %p3473_p10 }
  0x26   :  { %3483 = shalt.err (!%p3480_p0)
}
  0x27   :  { %s3603_s29 = smov 128   ;;  %s3604_s30 = smov 8  }
  0x28   :  { %33 = dma.hbm_to_vmem [thread:$0]  %s4035_s0, 2048, %s28_s28, [#allocation3], %s3603_s29, %s3603_s29, %s3604_s30  }
  0x29   :  { %s3605_s3 = smov [#allocation7]   ;;  %s3606_s14 = smov [#allocation10]  }
  0x2a   :  { %s52_s13 = sshll.u32 %s3605_s3, 4  ;;  %s75_s15 = sshll.u32 %s3606_s14, 4  ;;  %s53_s13 = int_to_ptr.vmem [resolvable:$true] %s52_s13  ;;  %s76_s15 = int_to_ptr.vmem [resolvable:$true] %s75_s15 }
  0x2b   :  { %s3492_s18 = scalar_lea.vmem %s53_s13, 64  ;;  %p3497_p2 = scmp.lt.s32.totalorder %s53_s13, %s53_s13 }
  0x2c   :  { %p3493_p1 = scmp.ne.s32.totalorder %s53_s13, %s3492_s18  ;;  %p3498_p3 = scmp.lt.s32.totalorder %s3492_s18, %s3492_s18 }
  0x2e   :  { %p3499_p4 = por %p3498_p3, %p3497_p2 }
  0x30   :  { %p3500_p5 = pnand %p3499_p4, %p3493_p1 }
  0x32   :  { %3503 = shalt.err (!%p3500_p5)
}
  0x33   :  { %55 = dma.hbm_to_vmem [thread:$0]  %s4037_s2, 64, %s53_s13, [#allocation6]  }
  0x34   :  { %s3512_s21 = scalar_lea.vmem %s76_s15, 4096  ;;  %p3517_p7 = scmp.lt.s32.totalorder %s76_s15, %s76_s15 }
  0x35   :  { %p3513_p6 = scmp.ne.s32.totalorder %s76_s15, %s3512_s21  ;;  %p3518_p8 = scmp.lt.s32.totalorder %s3512_s21, %s3512_s21 }
  0x37   :  { %p3519_p9 = por %p3518_p8, %p3517_p7 }
  0x39   :  { %p3520_p10 = pnand %p3519_p9, %p3513_p6 }
  0x3b   :  { %3523 = shalt.err (!%p3520_p10)
}
  0x3c   :  { %81 = dma.hbm_to_vmem [thread:$0]  %s4040_s5, 4096, %s76_s15, [#allocation9], %s3597_s16, %s3597_s16, %s3598_s17  }
  0x3d   :  { %s3607_s23 = smov [#allocation11]  }
  0x3e   :  { %s89_s24 = sshll.u32 %s3607_s23, 4  ;;  %s90_s24 = int_to_ptr.vmem [resolvable:$true] %s89_s24 }
  0x3f   :  { %s3532_s25 = scalar_lea.vmem %s90_s24, 8192  ;;  %p3537_p12 = scmp.lt.s32.totalorder %s90_s24, %s90_s24 }
  0x40   :  { %p3533_p11 = scmp.ne.s32.totalorder %s90_s24, %s3532_s25  ;;  %p3538_p13 = scmp.lt.s32.totalorder %s3532_s25, %s3532_s25 }
  0x42   :  { %p3539_p0 = por %p3538_p13, %p3537_p12 }
  0x44   :  { %p3540_p1 = pnand %p3539_p0, %p3533_p11 }
  0x46   :  { %3543 = shalt.err (!%p3540_p1)
}
  0x47   :  { %95 = dma.hbm_to_vmem [thread:$0]  %s4042_s7, 8192, %s90_s24, [#allocation12], %s3603_s29, %s3603_s29, %s3604_s30  }
  0x48   :  { %3584 = dma.done.wait [#allocation3], 2048  }
  0x49   :  { %3585 = vsyncadd [#allocation3], 4294965248 }
  0x4a   :  { %3586 = dma.done.wait [#allocation6], 8256  }
  0x4b   :  { %3587 = vsyncadd [#allocation6], 4294959040 }
  0x4c   :  { %3588 = dma.done.wait [#allocation9], 8192  }
  0x4d   :  { %3589 = vsyncadd [#allocation9], 4294959104 }
  0x4e   :  { %3590 = dma.done.wait [#allocation12], 8192  }
  0x4f   :  { %3591 = vsyncadd [#allocation12], 4294959104  ;;  %v3096_v0 = vld [vmem:[#allocation5 + $0xe4] ss:$16 sps:$4 sm:$0xff]   ;;  %v3098_v1 = vld [vmem:[#allocation5 + $0xec] ss:$16 sps:$4 sm:$0xff]  }
  0x50   :  { %619 = vmatprep.subr.bf16.mxu0 %v3096_v0  ;;  %v3100_v2 = vld [vmem:[#allocation5 + $0xe0] ss:$16 sps:$4 sm:$0xff]   ;;  %v3101_v3 = vld [vmem:[#allocation5 + $0xe8] ss:$16 sps:$4 sm:$0xff]   ;;  %732 = vmatprep.subr.bf16.mxu1 %v3098_v1  ;;  %v3102_v4 = vld [vmem:[#allocation5 + $0xc4] ss:$16 sps:$4 sm:$0xff]  }
  0x51   :  { %620 = vmatpush1.bf16.msra.mxu0 %v3100_v2  ;;  %733 = vmatpush1.bf16.msra.mxu1 %v3101_v3  ;;  %v3104_v5 = vld [vmem:[#allocation5 + $0xcc] ss:$16 sps:$4 sm:$0xff]   ;;  %v3106_v6 = vld [vmem:[#allocation5 + $0xc0] ss:$16 sps:$4 sm:$0xff]   ;;  %v3107_v7 = vld [vmem:[#allocation5 + $0xc8] ss:$16 sps:$4 sm:$0xff]  }
  0x52   :  { %621 = vmatprep.subr.bf16.mxu0 %v3102_v4  ;;  %734 = vmatprep.subr.bf16.mxu1 %v3104_v5  ;;  %v3108_v8 = vld [vmem:[#allocation5 + $0xa4] ss:$16 sps:$4 sm:$0xff]   ;;  %v3110_v9 = vld [vmem:[#allocation5 + $0xac] ss:$16 sps:$4 sm:$0xff]   ;;  %v3112_v10 = vld [vmem:[#allocation5 + $0xa0] ss:$16 sps:$4 sm:$0xff]  }
  0x53   :  { %v3113_v11 = vld [vmem:[#allocation5 + $0xa8] ss:$16 sps:$4 sm:$0xff]   ;;  %v3114_v12 = vld [vmem:[#allocation5 + $0x84] ss:$16 sps:$4 sm:$0xff]   ;;  %v3116_v13 = vld [vmem:[#allocation5 + $0x8c] ss:$16 sps:$4 sm:$0xff]  }
  0x54   :  { %v3118_v14 = vld [vmem:[#allocation5 + $0x80] ss:$16 sps:$4 sm:$0xff]   ;;  %v3119_v15 = vld [vmem:[#allocation5 + $0x88] ss:$16 sps:$4 sm:$0xff]   ;;  %v3120_v16 = vld [vmem:[#allocation5 + $0x64] ss:$16 sps:$4 sm:$0xff]  }
  0x55   :  { %622 = vmatpush1.bf16.msra.mxu0 %v3106_v6  ;;  %735 = vmatpush1.bf16.msra.mxu1 %v3107_v7  ;;  %v3122_v17 = vld [vmem:[#allocation5 + $0x6c] ss:$16 sps:$4 sm:$0xff]   ;;  %v3124_v18 = vld [vmem:[#allocation5 + $0x60] ss:$16 sps:$4 sm:$0xff]   ;;  %v3125_v19 = vld [vmem:[#allocation5 + $0x68] ss:$16 sps:$4 sm:$0xff]  }
  0x56   :  { %623 = vmatprep.subr.bf16.mxu0 %v3108_v8  ;;  %736 = vmatprep.subr.bf16.mxu1 %v3110_v9  ;;  %v3126_v20 = vld [vmem:[#allocation5 + $0x44] ss:$16 sps:$4 sm:$0xff]   ;;  %v3128_v21 = vld [vmem:[#allocation5 + $0x4c] ss:$16 sps:$4 sm:$0xff]   ;;  %v3130_v22 = vld [vmem:[#allocation5 + $0x40] ss:$16 sps:$4 sm:$0xff]  }
  0x57   :  { %v3131_v23 = vld [vmem:[#allocation5 + $0x48] ss:$16 sps:$4 sm:$0xff]   ;;  %v3132_v24 = vld [vmem:[#allocation5 + $0x24] ss:$16 sps:$4 sm:$0xff]   ;;  %v3134_v25 = vld [vmem:[#allocation5 + $0x2c] ss:$16 sps:$4 sm:$0xff]  }
  0x58   :  { %v3136_v26 = vld [vmem:[#allocation5 + $0x20] ss:$16 sps:$4 sm:$0xff]   ;;  %v3137_v27 = vld [vmem:[#allocation5 + $0x28] ss:$16 sps:$4 sm:$0xff]   ;;  %v3138_v28 = vld [vmem:[#allocation5 + $0x4] ss:$16 sps:$4 sm:$0xff]  }
  0x59   :  { %624 = vmatpush1.bf16.msra.mxu0 %v3112_v10  ;;  %737 = vmatpush1.bf16.msra.mxu1 %v3113_v11  ;;  %v3140_v29 = vld [vmem:[#allocation5 + $0xc] ss:$16 sps:$4 sm:$0xff]   ;;  %v3142_v30 = vld [vmem:[#allocation5] ss:$16 sps:$4 sm:$0xff]   ;;  %v3143_v31 = vld [vmem:[#allocation5 + $0x8] ss:$16 sps:$4 sm:$0xff]  }
  0x5a   :  { %625 = vmatprep.subr.bf16.mxu0 %v3114_v12  ;;  %738 = vmatprep.subr.bf16.mxu1 %v3116_v13  ;;  %v3144_v32 = vld [vmem:[#allocation5 + $0x1e4] ss:$16 sps:$4 sm:$0xff]   ;;  %v3146_v33 = vld [vmem:[#allocation5 + $0x1ec] ss:$16 sps:$4 sm:$0xff]   ;;  %v3148_v34 = vld [vmem:[#allocation5 + $0x1e0] ss:$16 sps:$4 sm:$0xff]  }
  0x5b   :  { %v3149_v35 = vld [vmem:[#allocation5 + $0x1e8] ss:$16 sps:$4 sm:$0xff]   ;;  %v3150_v36 = vld [vmem:[#allocation5 + $0x1c4] ss:$16 sps:$4 sm:$0xff]   ;;  %v3152_v37 = vld [vmem:[#allocation5 + $0x1cc] ss:$16 sps:$4 sm:$0xff]  }
  0x5c   :  { %v3154_v38 = vld [vmem:[#allocation5 + $0x1c0] ss:$16 sps:$4 sm:$0xff]   ;;  %v3155_v39 = vld [vmem:[#allocation5 + $0x1c8] ss:$16 sps:$4 sm:$0xff]   ;;  %v3156_v40 = vld [vmem:[#allocation5 + $0x1a4] ss:$16 sps:$4 sm:$0xff]  }
  0x5d   :  { %626 = vmatpush1.bf16.msra.mxu0 %v3118_v14  ;;  %739 = vmatpush1.bf16.msra.mxu1 %v3119_v15  ;;  %v3158_v41 = vld [vmem:[#allocation5 + $0x1ac] ss:$16 sps:$4 sm:$0xff]   ;;  %v3160_v42 = vld [vmem:[#allocation5 + $0x1a0] ss:$16 sps:$4 sm:$0xff]   ;;  %v3161_v43 = vld [vmem:[#allocation5 + $0x1a8] ss:$16 sps:$4 sm:$0xff]  }
  0x5e   :  { %627 = vmatprep.subr.bf16.mxu0 %v3120_v16  ;;  %740 = vmatprep.subr.bf16.mxu1 %v3122_v17  ;;  %v3162_v44 = vld [vmem:[#allocation5 + $0x184] ss:$16 sps:$4 sm:$0xff]   ;;  %v3164_v45 = vld [vmem:[#allocation5 + $0x18c] ss:$16 sps:$4 sm:$0xff]   ;;  %v3166_v46 = vld [vmem:[#allocation5 + $0x180] ss:$16 sps:$4 sm:$0xff]  }
  0x5f   :  { %v3167_v47 = vld [vmem:[#allocation5 + $0x188] ss:$16 sps:$4 sm:$0xff]   ;;  %v3194_v48 = vld [vmem:[#allocation2 + $0x4] ss:$8 sps:$4 sm:$0xff]   ;;  %v3172_v51 = vld [vmem:[#allocation5 + $0x160] ss:$16 sps:$4 sm:$0xff]  }
  0x60   :  { %v3168_v49 = vld [vmem:[#allocation5 + $0x164] ss:$16 sps:$4 sm:$0xff]   ;;  %v3170_v50 = vld [vmem:[#allocation5 + $0x16c] ss:$16 sps:$4 sm:$0xff]   ;;  %651 = vmatprep.mubr.bf16.mxu0 %v3194_v48  ;;  %764 = vmatprep.mubr.bf16.mxu1 %v3194_v48  ;;  %v3173_v52 = vld [vmem:[#allocation5 + $0x168] ss:$16 sps:$4 sm:$0xff]   ;;  %v199_v48 = vlaneseq }
  0x61   :  { %628 = vmatpush1.bf16.msra.mxu0 %v3124_v18  ;;  %741 = vmatpush1.bf16.msra.mxu1 %v3125_v19  ;;  %v3174_v53 = vld [vmem:[#allocation5 + $0x144] ss:$16 sps:$4 sm:$0xff]   ;;  %v3176_v54 = vld [vmem:[#allocation5 + $0x14c] ss:$16 sps:$4 sm:$0xff]   ;;  %v3178_v55 = vld [vmem:[#allocation5 + $0x140] ss:$16 sps:$4 sm:$0xff]  }
  0x62   :  { %629 = vmatprep.subr.bf16.mxu0 %v3126_v20  ;;  %742 = vmatprep.subr.bf16.mxu1 %v3128_v21  ;;  %v3179_v56 = vld [vmem:[#allocation5 + $0x148] ss:$16 sps:$4 sm:$0xff]   ;;  %v3180_v57 = vld [vmem:[#allocation5 + $0x124] ss:$16 sps:$4 sm:$0xff]   ;;  %v3182_v58 = vld [vmem:[#allocation5 + $0x12c] ss:$16 sps:$4 sm:$0xff]  }
  0x63   :  { %v3184_v59 = vld [vmem:[#allocation5 + $0x120] ss:$16 sps:$4 sm:$0xff]   ;;  %v3185_v60 = vld [vmem:[#allocation5 + $0x128] ss:$16 sps:$4 sm:$0xff]   ;;  %v3186_v61 = vld [vmem:[#allocation5 + $0x104] ss:$16 sps:$4 sm:$0xff]  }
  0x64   :  { %v3188_v62 = vld [vmem:[#allocation5 + $0x10c] ss:$16 sps:$4 sm:$0xff]   ;;  %v3190_v63 = vld [vmem:[#allocation5 + $0x100] ss:$16 sps:$4 sm:$0xff]   ;;  %v3191_v0 = vld [vmem:[#allocation5 + $0x108] ss:$16 sps:$4 sm:$0xff]  }
  0x65   :  { %630 = vmatpush1.bf16.msra.mxu0 %v3130_v22  ;;  %743 = vmatpush1.bf16.msra.mxu1 %v3131_v23  ;;  %v3216_v1 = vld [vmem:[#allocation8 + $0x78] sm:$0xff]   ;;  %v3220_v7 = vld [vmem:[#allocation8 + $0x70] sm:$0xff]   ;;  %v3224_v12 = vld [vmem:[#allocation8 + $0x68] sm:$0xff]  }
  0x66   :  { %631 = vmatprep.subr.bf16.mxu0 %v3132_v24  ;;  %744 = vmatprep.subr.bf16.mxu1 %v3134_v25  ;;  %v3192_v2 = vld [vmem:[#allocation2] ss:$8 sps:$4 sm:$0xff]   ;;  %v3195_v4 = vld [vmem:[#allocation2 + $0x14] ss:$8 sps:$4 sm:$0xff]   ;;  %v3197_v11 = vld [vmem:[#allocation2 + $0x10] ss:$8 sps:$4 sm:$0xff]  }
  0x67   :  { %v3218_v3 = vld [vmem:[#allocation8 + $0xf8] sm:$0xff]   ;;  %v3222_v8 = vld [vmem:[#allocation8 + $0xf0] sm:$0xff]   ;;  %v3198_v13 = vld [vmem:[#allocation2 + $0x24] ss:$8 sps:$4 sm:$0xff]  }
  0x68   :  { %v3217_v5 = vld [vmem:[#allocation8 + $0x38] sm:$0xff]   ;;  %v3221_v9 = vld [vmem:[#allocation8 + $0x30] sm:$0xff]   ;;  %v3226_v14 = vld [vmem:[#allocation8 + $0xe8] sm:$0xff]  }
  0x69   :  { %632 = vmatpush1.bf16.msra.mxu0 %v3136_v26  ;;  %745 = vmatpush1.bf16.msra.mxu1 %v3137_v27  ;;  %v3219_v6 = vld [vmem:[#allocation8 + $0xb8] sm:$0xff]   ;;  %v3223_v10 = vld [vmem:[#allocation8 + $0xb0] sm:$0xff]   ;;  %v3225_v15 = vld [vmem:[#allocation8 + $0x28] sm:$0xff]  }
  0x6a   :  { %633 = vmatprep.subr.bf16.mxu0 %v3138_v28  ;;  %746 = vmatprep.subr.bf16.mxu1 %v3140_v29  ;;  %v3227_v16 = vld [vmem:[#allocation8 + $0xa8] sm:$0xff]   ;;  %v3228_v17 = vld [vmem:[#allocation8 + $0x60] sm:$0xff]   ;;  %v3232_v22 = vld [vmem:[#allocation8 + $0x58] sm:$0xff]  }
  0x6b   :  { %v3230_v18 = vld [vmem:[#allocation8 + $0xe0] sm:$0xff]   ;;  %v3201_v23 = vld [vmem:[#allocation2 + $0x34] ss:$8 sps:$4 sm:$0xff]  }
  0x6c   :  { %v3229_v19 = vld [vmem:[#allocation8 + $0x20] sm:$0xff]   ;;  %v3234_v24 = vld [vmem:[#allocation8 + $0xd8] sm:$0xff]   ;;  %v3236_v27 = vld [vmem:[#allocation8 + $0x50] sm:$0xff]  }
  0x6d   :  { %634 = vmatpush1.bf16.msra.mxu0 %v3142_v30  ;;  %747 = vmatpush1.bf16.msra.mxu1 %v3143_v31  ;;  %v3231_v20 = vld [vmem:[#allocation8 + $0xa0] sm:$0xff]   ;;  %v3233_v25 = vld [vmem:[#allocation8 + $0x18] sm:$0xff]   ;;  %v3238_v28 = vld [vmem:[#allocation8 + $0xd0] sm:$0xff]  }
  0x6e   :  { %635 = vmatprep.subr.bf16.mxu0 %v3144_v32  ;;  %748 = vmatprep.subr.bf16.mxu1 %v3146_v33  ;;  %v3200_v21 = vld [vmem:[#allocation2 + $0x20] ss:$8 sps:$4 sm:$0xff]   ;;  %v3237_v29 = vld [vmem:[#allocation8 + $0x10] sm:$0xff]   ;;  %v3240_v31 = vld [vmem:[#allocation8 + $0x48] sm:$0xff]  }
  0x6f   :  { %v3235_v26 = vld [vmem:[#allocation8 + $0x98] sm:$0xff]   ;;  %v3239_v30 = vld [vmem:[#allocation8 + $0x90] sm:$0xff]   ;;  %v3242_v32 = vld [vmem:[#allocation8 + $0xc8] sm:$0xff]  }
  0x70   :  { %v3203_v33 = vld [vmem:[#allocation2 + $0x30] ss:$8 sps:$4 sm:$0xff]  }
  0x71   :  { %636 = vmatpush2.bf16.msra.mxu0 %v3148_v34  ;;  %749 = vmatpush2.bf16.msra.mxu1 %v3149_v35  ;;  %v3204_v34 = vld [vmem:[#allocation2 + $0x44] ss:$8 sps:$4 sm:$0xff]  }
  0x72   :  { %637 = vmatprep.subr.bf16.mxu0 %v3150_v36  ;;  %750 = vmatprep.subr.bf16.mxu1 %v3152_v37  ;;  %v3241_v35 = vld [vmem:[#allocation8 + $0x8] sm:$0xff]   ;;  %v3206_v36 = vld [vmem:[#allocation2 + $0x40] ss:$8 sps:$4 sm:$0xff]   ;;  %v3207_v37 = vld [vmem:[#allocation2 + $0x54] ss:$8 sps:$4 sm:$0xff]  }
  0x75   :  { %638 = vmatpush2.bf16.msra.mxu0 %v3154_v38  ;;  %751 = vmatpush2.bf16.msra.mxu1 %v3155_v39  ;;  %v3209_v38 = vld [vmem:[#allocation2 + $0x50] ss:$8 sps:$4 sm:$0xff]   ;;  %v3210_v39 = vld [vmem:[#allocation2 + $0x64] ss:$8 sps:$4 sm:$0xff]  }
  0x76   :  { %639 = vmatprep.subr.bf16.mxu0 %v3156_v40  ;;  %752 = vmatprep.subr.bf16.mxu1 %v3158_v41  ;;  %v3212_v40 = vld [vmem:[#allocation2 + $0x60] ss:$8 sps:$4 sm:$0xff]   ;;  %v3213_v41 = vld [vmem:[#allocation2 + $0x74] ss:$8 sps:$4 sm:$0xff]  }
  0x79   :  { %640 = vmatpush2.bf16.msra.mxu0 %v3160_v42  ;;  %753 = vmatpush2.bf16.msra.mxu1 %v3161_v43  ;;  %v3215_v42 = vld [vmem:[#allocation2 + $0x70] ss:$8 sps:$4 sm:$0xff]  }
  0x7a   :  { %641 = vmatprep.subr.bf16.mxu0 %v3162_v44  ;;  %754 = vmatprep.subr.bf16.mxu1 %v3164_v45  ;;  %v3243_v43 = vld [vmem:[#allocation8 + $0x88] sm:$0xff]   ;;  %v3244_v44 = vld [vmem:[#allocation8 + $0x40] sm:$0xff]  }
  0x7b   :  { %v3246_v45 = vld [vmem:[#allocation8 + $0xc0] sm:$0xff]  }
  0x7d   :  { %642 = vmatpush2.bf16.msra.mxu0 %v3166_v46  ;;  %755 = vmatpush2.bf16.msra.mxu1 %v3167_v47  ;;  %v3245_v46 = vld [vmem:[#allocation8] sm:$0xff]  }
  0x7e   :  { %643 = vmatprep.subr.bf16.mxu0 %v3168_v49  ;;  %756 = vmatprep.subr.bf16.mxu1 %v3170_v50  ;;  %v3247_v47 = vld [vmem:[#allocation8 + $0x80] sm:$0xff]   ;;  %v3696_v49 = vshrl.u32 %v199_v48, 7 }
  0x80   :  { %v3699_v50 = vsub.s32 1, %v3696_v49 }
  0x81   :  { %644 = vmatpush2.bf16.msra.mxu0 %v3172_v51  ;;  %757 = vmatpush2.bf16.msra.mxu1 %v3173_v52  ;;  %v213_v51 = vsub.s32 3, %v3696_v49  ;;  %v3703_v52 = vsub.s32 0, %v3696_v49 }
  0x82   :  { %645 = vmatprep.subr.bf16.mxu0 %v3174_v53  ;;  %758 = vmatprep.subr.bf16.mxu1 %v3176_v54  ;;  %v209_v53 = vsub.s32 2, %v3696_v49  ;;  %v197_v54 = vld [vmem:[#allocation7] sm:$0xf] }
  0x85   :  { %646 = vmatpush2.bf16.msra.mxu0 %v3178_v55  ;;  %759 = vmatpush2.bf16.msra.mxu1 %v3179_v56 }
  0x86   :  { %647 = vmatprep.subr.bf16.mxu0 %v3180_v57  ;;  %760 = vmatprep.subr.bf16.mxu1 %v3182_v58  ;;  %v3707_v57 = vrot.slane %v197_v54, %v3699_v50  ;;  %v3711_v58 = vrot.slane %v197_v54, %v213_v51 }
  0x89   :  { %648 = vmatpush2.bf16.msra.mxu0 %v3184_v59  ;;  %761 = vmatpush2.bf16.msra.mxu1 %v3185_v60  ;;  %v3714_v59 = vrot.slane %v197_v54, %v3703_v52  ;;  %v3718_v60 = vrot.slane %v197_v54, %v209_v53 }
  0x8a   :  { %649 = vmatprep.subr.bf16.mxu0 %v3186_v61  ;;  %762 = vmatprep.subr.bf16.mxu1 %v3188_v62 }
  0x8d   :  { %650 = vmatpush2.bf16.msra.mxu0 %v3190_v63  ;;  %763 = vmatpush2.bf16.msra.mxu1 %v3191_v0 }
  0x8e   :  { %2953 = vmatprep.subr.bf16.mxu0 %v3216_v1  ;;  %3017 = vmatprep.subr.bf16.mxu1 %v3218_v3 }
  0x90   :  { %652 = vmatmul.mubr.bf16.vlgmr.msra.gmra.mxu0 %v3192_v2  ;;  %765 = vmatmul.mubr.bf16.vlgmr.msra.gmra.mxu1 %v3192_v2 }
  0x91   :  { %661 = vmatprep.mubr.bf16.mxu0 %v3195_v4  ;;  %774 = vmatprep.mubr.bf16.mxu1 %v3195_v4 }
  0x92   :  { %2954 = vmatpush3.bf16.msra.mxu0 %v3217_v5  ;;  %3018 = vmatpush3.bf16.msra.mxu1 %v3219_v6 }
  0x93   :  { %2955 = vmatprep.subr.bf16.mxu0 %v3220_v7  ;;  %3019 = vmatprep.subr.bf16.mxu1 %v3222_v8 }
  0x96   :  { %2956 = vmatpush3.bf16.msra.mxu0 %v3221_v9  ;;  %3020 = vmatpush3.bf16.msra.mxu1 %v3223_v10 }
  0x97   :  { %2957 = vmatprep.subr.bf16.mxu0 %v3224_v12  ;;  %3021 = vmatprep.subr.bf16.mxu1 %v3226_v14 }
  0x98   :  { %662 = vmatmul.mubr.bf16.gmra.mxu0 %v3197_v11  ;;  %775 = vmatmul.mubr.bf16.gmra.mxu1 %v3197_v11 }
  0x99   :  { %671 = vmatprep.mubr.bf16.mxu0 %v3198_v13  ;;  %784 = vmatprep.mubr.bf16.mxu1 %v3198_v13 }
  0x9a   :  { %2958 = vmatpush3.bf16.msra.mxu0 %v3225_v15  ;;  %3022 = vmatpush3.bf16.msra.mxu1 %v3227_v16 }
  0x9b   :  { %2959 = vmatprep.subr.bf16.mxu0 %v3228_v17  ;;  %3023 = vmatprep.subr.bf16.mxu1 %v3230_v18 }
  0x9e   :  { %2960 = vmatpush3.bf16.msra.mxu0 %v3229_v19  ;;  %3024 = vmatpush3.bf16.msra.mxu1 %v3231_v20 }
  0x9f   :  { %2961 = vmatprep.subr.bf16.mxu0 %v3232_v22  ;;  %3025 = vmatprep.subr.bf16.mxu1 %v3234_v24 }
  0xa0   :  { %672 = vmatmul.mubr.bf16.gmra.mxu0 %v3200_v21  ;;  %785 = vmatmul.mubr.bf16.gmra.mxu1 %v3200_v21 }
  0xa1   :  { %681 = vmatprep.mubr.bf16.mxu0 %v3201_v23  ;;  %794 = vmatprep.mubr.bf16.mxu1 %v3201_v23 }
  0xa2   :  { %2962 = vmatpush3.bf16.msra.mxu0 %v3233_v25  ;;  %3026 = vmatpush3.bf16.msra.mxu1 %v3235_v26 }
  0xa3   :  { %2963 = vmatprep.subr.bf16.mxu0 %v3236_v27  ;;  %3027 = vmatprep.subr.bf16.mxu1 %v3238_v28 }
  0xa6   :  { %2964 = vmatpush3.bf16.msra.mxu0 %v3237_v29  ;;  %3028 = vmatpush3.bf16.msra.mxu1 %v3239_v30 }
  0xa7   :  { %2965 = vmatprep.subr.bf16.mxu0 %v3240_v31  ;;  %3029 = vmatprep.subr.bf16.mxu1 %v3242_v32 }
  0xa8   :  { %682 = vmatmul.mubr.bf16.gmra.mxu0 %v3203_v33  ;;  %795 = vmatmul.mubr.bf16.gmra.mxu1 %v3203_v33 }
  0xa9   :  { %691 = vmatprep.mubr.bf16.mxu0 %v3204_v34  ;;  %804 = vmatprep.mubr.bf16.mxu1 %v3204_v34 }
  0xaa   :  { %2966 = vmatpush3.bf16.msra.mxu0 %v3241_v35  ;;  %3030 = vmatpush3.bf16.msra.mxu1 %v3243_v43 }
  0xab   :  { %2967 = vmatprep.subr.bf16.mxu0 %v3244_v44  ;;  %3031 = vmatprep.subr.bf16.mxu1 %v3246_v45 }
  0xae   :  { %2968 = vmatpush3.bf16.msra.mxu0 %v3245_v46  ;;  %3032 = vmatpush3.bf16.msra.mxu1 %v3247_v47 }
  0xb0   :  { %692 = vmatmul.mubr.bf16.gmra.mxu0 %v3206_v36  ;;  %805 = vmatmul.mubr.bf16.gmra.mxu1 %v3206_v36 }
  0xb1   :  { %701 = vmatprep.mubr.bf16.mxu0 %v3207_v37  ;;  %814 = vmatprep.mubr.bf16.mxu1 %v3207_v37 }
  0xb8   :  { %702 = vmatmul.mubr.bf16.gmra.mxu0 %v3209_v38  ;;  %815 = vmatmul.mubr.bf16.gmra.mxu1 %v3209_v38 }
  0xb9   :  { %711 = vmatprep.mubr.bf16.mxu0 %v3210_v39  ;;  %824 = vmatprep.mubr.bf16.mxu1 %v3210_v39 }
  0xc0   :  { %712 = vmatmul.mubr.bf16.gmra.mxu0 %v3212_v40  ;;  %825 = vmatmul.mubr.bf16.gmra.mxu1 %v3212_v40 }
  0xc1   :  { %721 = vmatprep.mubr.bf16.mxu0 %v3213_v41  ;;  %834 = vmatprep.mubr.bf16.mxu1 %v3213_v41 }
  0xc8   :  { %722 = vmatmul.mubr.bf16.gmra.mxu0 %v3215_v42  ;;  %835 = vmatmul.mubr.bf16.gmra.mxu1 %v3215_v42 }
 0x150   :  { %v653_v55 = vpop.f32.mrf.mxu0  ;;  %v766_v56 = vpop.f32.mrf.mxu1 }
 0x151   :  { %v654_v5 = vadd.f32 %v653_v55, %v3714_v59  ;;  %v767_v6 = vadd.f32 %v766_v56, %v3718_v60 }
 0x152   :  { %v655_v61 = vpop.f32.mrf.mxu0  ;;  %v768_v62 = vpop.f32.mrf.mxu1 }
 0x153   :  { %v656_v1 = vadd.f32 %v655_v61, %v3707_v57  ;;  %v769_v2 = vadd.f32 %v768_v62, %v3711_v58  ;;  %v845_v19 = vmax.f32 %v654_v5, 0.0  ;;  %v847_v20 = vmax.f32 %v767_v6, 0.0 }
 0x154   :  { %v657_v63 = vpop.f32.mrf.mxu0  ;;  %v770_v0 = vpop.f32.mrf.mxu1 }
 0x155   :  { %v658_v3 = vadd.f32 %v657_v63, %v3714_v59  ;;  %v771_v4 = vadd.f32 %v770_v0, %v3718_v60  ;;  %v846_v15 = vmax.f32 %v656_v1, 0.0  ;;  %v848_v16 = vmax.f32 %v769_v2, 0.0 }
 0x156   :  { %v659_v7 = vpop.f32.mrf.mxu0  ;;  %v772_v8 = vpop.f32.mrf.mxu1 }
 0x157   :  { %v660_v9 = vadd.f32 %v659_v7, %v3707_v57  ;;  %v773_v10 = vadd.f32 %v772_v8, %v3711_v58  ;;  %v849_v11 = vmax.f32 %v658_v3, 0.0  ;;  %v851_v12 = vmax.f32 %v771_v4, 0.0 }
 0x158   :  { %v663_v13 = vpop.f32.mrf.mxu0  ;;  %v776_v14 = vpop.f32.mrf.mxu1 }
 0x159   :  { %v850_v17 = vmax.f32 %v660_v9, 0.0  ;;  %v852_v18 = vmax.f32 %v773_v10, 0.0  ;;  %v909_v25 = vpack.c.bf16 %v849_v11, %v845_v19  ;;  %v911_v26 = vpack.c.bf16 %v851_v12, %v847_v20 }
 0x15a   :  { %v665_v21 = vpop.f32.mrf.mxu0  ;;  %v778_v22 = vpop.f32.mrf.mxu1  ;;  %v664_v33 = vadd.f32 %v663_v13, %v3714_v59  ;;  %v777_v34 = vadd.f32 %v776_v14, %v3718_v60 }
 0x15b   :  { %v910_v23 = vpack.c.bf16 %v850_v17, %v846_v15  ;;  %v912_v24 = vpack.c.bf16 %v852_v18, %v848_v16  ;;  %v666_v27 = vadd.f32 %v665_v21, %v3707_v57  ;;  %v779_v30 = vadd.f32 %v778_v22, %v3711_v58 }
 0x15c   :  { %v667_v28 = vpop.f32.mrf.mxu0  ;;  %v780_v29 = vpop.f32.mrf.mxu1  ;;  %v853_v47 = vmax.f32 %v664_v33, 0.0  ;;  %v855_v48 = vmax.f32 %v777_v34, 0.0 }
 0x15d   :  { %v668_v31 = vadd.f32 %v667_v28, %v3714_v59  ;;  %v781_v32 = vadd.f32 %v780_v29, %v3718_v60  ;;  %1236 = vmatprep.mubr.bf16.mxu0 %v910_v23  ;;  %1333 = vmatprep.mubr.bf16.mxu1 %v912_v24  ;;  %v854_v43 = vmax.f32 %v666_v27, 0.0  ;;  %v856_v44 = vmax.f32 %v779_v30, 0.0 }
 0x15e   :  { %v669_v35 = vpop.f32.mrf.mxu0  ;;  %v782_v36 = vpop.f32.mrf.mxu1  ;;  %1237 = vmatmul.mubr.bf16.vlgmr.msra.gmra.mxu0 %v909_v25  ;;  %1334 = vmatmul.mubr.bf16.vlgmr.msra.gmra.mxu1 %v911_v26 }
 0x15f   :  { %v670_v37 = vadd.f32 %v669_v35, %v3707_v57  ;;  %v783_v38 = vadd.f32 %v782_v36, %v3711_v58  ;;  %v857_v39 = vmax.f32 %v668_v31, 0.0  ;;  %v859_v40 = vmax.f32 %v781_v32, 0.0 }
 0x160   :  { %v673_v41 = vpop.f32.mrf.mxu0  ;;  %v786_v42 = vpop.f32.mrf.mxu1 }
 0x161   :  { %v858_v45 = vmax.f32 %v670_v37, 0.0  ;;  %v860_v46 = vmax.f32 %v783_v38, 0.0  ;;  %v913_v62 = vpack.c.bf16 %v857_v39, %v853_v47  ;;  %v915_v63 = vpack.c.bf16 %v859_v40, %v855_v48 }
 0x162   :  { %v675_v54 = vpop.f32.mrf.mxu0  ;;  %v788_v55 = vpop.f32.mrf.mxu1  ;;  %v674_v6 = vadd.f32 %v673_v41, %v3714_v59  ;;  %v787_v7 = vadd.f32 %v786_v42, %v3718_v60 }
 0x163   :  { %v914_v56 = vpack.c.bf16 %v858_v45, %v854_v43  ;;  %v916_v61 = vpack.c.bf16 %v860_v46, %v856_v44  ;;  %v676_v0 = vadd.f32 %v675_v54, %v3707_v57  ;;  %v789_v3 = vadd.f32 %v788_v55, %v3711_v58 }
 0x164   :  { %v677_v1 = vpop.f32.mrf.mxu0  ;;  %v790_v2 = vpop.f32.mrf.mxu1  ;;  %v861_v20 = vmax.f32 %v674_v6, 0.0  ;;  %v863_v21 = vmax.f32 %v787_v7, 0.0 }
 0x165   :  { %v678_v4 = vadd.f32 %v677_v1, %v3714_v59  ;;  %v791_v5 = vadd.f32 %v790_v2, %v3718_v60  ;;  %1244 = vmatprep.mubr.bf16.mxu0 %v914_v56  ;;  %1341 = vmatprep.mubr.bf16.mxu1 %v916_v61  ;;  %v862_v16 = vmax.f32 %v676_v0, 0.0  ;;  %v864_v17 = vmax.f32 %v789_v3, 0.0 }
 0x166   :  { %v679_v8 = vpop.f32.mrf.mxu0  ;;  %v792_v9 = vpop.f32.mrf.mxu1  ;;  %1245 = vmatmul.mubr.bf16.gmra.mxu0 %v913_v62  ;;  %1342 = vmatmul.mubr.bf16.gmra.mxu1 %v915_v63 }
 0x167   :  { %v680_v10 = vadd.f32 %v679_v8, %v3707_v57  ;;  %v793_v11 = vadd.f32 %v792_v9, %v3711_v58  ;;  %v865_v12 = vmax.f32 %v678_v4, 0.0  ;;  %v867_v13 = vmax.f32 %v791_v5, 0.0 }
 0x168   :  { %v683_v14 = vpop.f32.mrf.mxu0  ;;  %v796_v15 = vpop.f32.mrf.mxu1 }
 0x169   :  { %v866_v18 = vmax.f32 %v680_v10, 0.0  ;;  %v868_v19 = vmax.f32 %v793_v11, 0.0  ;;  %v917_v26 = vpack.c.bf16 %v865_v12, %v861_v20  ;;  %v919_v27 = vpack.c.bf16 %v867_v13, %v863_v21 }
 0x16a   :  { %v685_v22 = vpop.f32.mrf.mxu0  ;;  %v798_v23 = vpop.f32.mrf.mxu1  ;;  %v684_v34 = vadd.f32 %v683_v14, %v3714_v59  ;;  %v797_v35 = vadd.f32 %v796_v15, %v3718_v60 }
 0x16b   :  { %v918_v24 = vpack.c.bf16 %v866_v18, %v862_v16  ;;  %v920_v25 = vpack.c.bf16 %v868_v19, %v864_v17  ;;  %v686_v28 = vadd.f32 %v685_v22, %v3707_v57  ;;  %v799_v31 = vadd.f32 %v798_v23, %v3711_v58 }
 0x16c   :  { %v687_v29 = vpop.f32.mrf.mxu0  ;;  %v800_v30 = vpop.f32.mrf.mxu1  ;;  %v869_v48 = vmax.f32 %v684_v34, 0.0  ;;  %v871_v54 = vmax.f32 %v797_v35, 0.0 }
 0x16d   :  { %v688_v32 = vadd.f32 %v687_v29, %v3714_v59  ;;  %v801_v33 = vadd.f32 %v800_v30, %v3718_v60  ;;  %1252 = vmatprep.mubr.bf16.mxu0 %v918_v24  ;;  %1349 = vmatprep.mubr.bf16.mxu1 %v920_v25  ;;  %v870_v44 = vmax.f32 %v686_v28, 0.0  ;;  %v872_v45 = vmax.f32 %v799_v31, 0.0 }
 0x16e   :  { %v689_v36 = vpop.f32.mrf.mxu0  ;;  %v802_v37 = vpop.f32.mrf.mxu1  ;;  %1253 = vmatmul.mubr.bf16.gmra.mxu0 %v917_v26  ;;  %1350 = vmatmul.mubr.bf16.gmra.mxu1 %v919_v27 }
 0x16f   :  { %v690_v38 = vadd.f32 %v689_v36, %v3707_v57  ;;  %v803_v39 = vadd.f32 %v802_v37, %v3711_v58  ;;  %v873_v40 = vmax.f32 %v688_v32, 0.0  ;;  %v875_v41 = vmax.f32 %v801_v33, 0.0 }
 0x170   :  { %v693_v42 = vpop.f32.mrf.mxu0  ;;  %v806_v43 = vpop.f32.mrf.mxu1 }
 0x171   :  { %v874_v46 = vmax.f32 %v690_v38, 0.0  ;;  %v876_v47 = vmax.f32 %v803_v39, 0.0  ;;  %v921_v63 = vpack.c.bf16 %v873_v40, %v869_v48  ;;  %v923_v0 = vpack.c.bf16 %v875_v41, %v871_v54 }
 0x172   :  { %v695_v55 = vpop.f32.mrf.mxu0  ;;  %v808_v56 = vpop.f32.mrf.mxu1  ;;  %v694_v7 = vadd.f32 %v693_v42, %v3714_v59  ;;  %v807_v8 = vadd.f32 %v806_v43, %v3718_v60 }
 0x173   :  { %v922_v61 = vpack.c.bf16 %v874_v46, %v870_v44  ;;  %v924_v62 = vpack.c.bf16 %v876_v47, %v872_v45  ;;  %v696_v1 = vadd.f32 %v695_v55, %v3707_v57  ;;  %v809_v4 = vadd.f32 %v808_v56, %v3711_v58 }
 0x174   :  { %v697_v2 = vpop.f32.mrf.mxu0  ;;  %v810_v3 = vpop.f32.mrf.mxu1  ;;  %v877_v21 = vmax.f32 %v694_v7, 0.0  ;;  %v879_v22 = vmax.f32 %v807_v8, 0.0 }
 0x175   :  { %v698_v5 = vadd.f32 %v697_v2, %v3714_v59  ;;  %v811_v6 = vadd.f32 %v810_v3, %v3718_v60  ;;  %1260 = vmatprep.mubr.bf16.mxu0 %v922_v61  ;;  %1357 = vmatprep.mubr.bf16.mxu1 %v924_v62  ;;  %v878_v17 = vmax.f32 %v696_v1, 0.0  ;;  %v880_v18 = vmax.f32 %v809_v4, 0.0 }
 0x176   :  { %v699_v9 = vpop.f32.mrf.mxu0  ;;  %v812_v10 = vpop.f32.mrf.mxu1  ;;  %1261 = vmatmul.mubr.bf16.gmra.mxu0 %v921_v63  ;;  %1358 = vmatmul.mubr.bf16.gmra.mxu1 %v923_v0 }
 0x177   :  { %v700_v11 = vadd.f32 %v699_v9, %v3707_v57  ;;  %v813_v12 = vadd.f32 %v812_v10, %v3711_v58  ;;  %v881_v13 = vmax.f32 %v698_v5, 0.0  ;;  %v883_v14 = vmax.f32 %v811_v6, 0.0 }
 0x178   :  { %v703_v15 = vpop.f32.mrf.mxu0  ;;  %v816_v16 = vpop.f32.mrf.mxu1 }
 0x179   :  { %v882_v19 = vmax.f32 %v700_v11, 0.0  ;;  %v884_v20 = vmax.f32 %v813_v12, 0.0  ;;  %v925_v27 = vpack.c.bf16 %v881_v13, %v877_v21  ;;  %v927_v28 = vpack.c.bf16 %v883_v14, %v879_v22 }
 0x17a   :  { %v705_v23 = vpop.f32.mrf.mxu0  ;;  %v818_v24 = vpop.f32.mrf.mxu1  ;;  %v704_v35 = vadd.f32 %v703_v15, %v3714_v59  ;;  %v817_v36 = vadd.f32 %v816_v16, %v3718_v60 }
 0x17b   :  { %v926_v25 = vpack.c.bf16 %v882_v19, %v878_v17  ;;  %v928_v26 = vpack.c.bf16 %v884_v20, %v880_v18  ;;  %v706_v29 = vadd.f32 %v705_v23, %v3707_v57  ;;  %v819_v32 = vadd.f32 %v818_v24, %v3711_v58 }
 0x17c   :  { %v707_v30 = vpop.f32.mrf.mxu0  ;;  %v820_v31 = vpop.f32.mrf.mxu1  ;;  %v885_v54 = vmax.f32 %v704_v35, 0.0  ;;  %v887_v55 = vmax.f32 %v817_v36, 0.0 }
 0x17d   :  { %v708_v33 = vadd.f32 %v707_v30, %v3714_v59  ;;  %v821_v34 = vadd.f32 %v820_v31, %v3718_v60  ;;  %1268 = vmatprep.mubr.bf16.mxu0 %v926_v25  ;;  %1365 = vmatprep.mubr.bf16.mxu1 %v928_v26  ;;  %v886_v45 = vmax.f32 %v706_v29, 0.0  ;;  %v888_v46 = vmax.f32 %v819_v32, 0.0 }
 0x17e   :  { %v709_v37 = vpop.f32.mrf.mxu0  ;;  %v822_v38 = vpop.f32.mrf.mxu1  ;;  %1269 = vmatmul.mubr.bf16.gmra.mxu0 %v925_v27  ;;  %1366 = vmatmul.mubr.bf16.gmra.mxu1 %v927_v28 }
 0x17f   :  { %v710_v39 = vadd.f32 %v709_v37, %v3707_v57  ;;  %v823_v40 = vadd.f32 %v822_v38, %v3711_v58  ;;  %v889_v41 = vmax.f32 %v708_v33, 0.0  ;;  %v891_v42 = vmax.f32 %v821_v34, 0.0 }
 0x180   :  { %v713_v43 = vpop.f32.mrf.mxu0  ;;  %v826_v44 = vpop.f32.mrf.mxu1 }
 0x181   :  { %v890_v47 = vmax.f32 %v710_v39, 0.0  ;;  %v892_v48 = vmax.f32 %v823_v40, 0.0  ;;  %v929_v0 = vpack.c.bf16 %v889_v41, %v885_v54  ;;  %v931_v1 = vpack.c.bf16 %v891_v42, %v887_v55 }
 0x182   :  { %v715_v56 = vpop.f32.mrf.mxu0  ;;  %v828_v61 = vpop.f32.mrf.mxu1  ;;  %v714_v8 = vadd.f32 %v713_v43, %v3714_v59  ;;  %v827_v9 = vadd.f32 %v826_v44, %v3718_v60 }
 0x183   :  { %v930_v62 = vpack.c.bf16 %v890_v47, %v886_v45  ;;  %v932_v63 = vpack.c.bf16 %v892_v48, %v888_v46  ;;  %v716_v2 = vadd.f32 %v715_v56, %v3707_v57  ;;  %v829_v5 = vadd.f32 %v828_v61, %v3711_v58  ;;  %v3248_v61 = vld [vmem:[#allocation10 + $0xe0] ss:$16 sps:$4 sm:$0xff]  }
 0x184   :  { %v717_v3 = vpop.f32.mrf.mxu0  ;;  %v830_v4 = vpop.f32.mrf.mxu1  ;;  %v893_v22 = vmax.f32 %v714_v8, 0.0  ;;  %v895_v23 = vmax.f32 %v827_v9, 0.0  ;;  %v3271_v8 = vld [vmem:[#allocation10 + $0x8c] ss:$16 sps:$4 sm:$0xff]   ;;  %v3266_v9 = vld [vmem:[#allocation10 + $0x80] ss:$16 sps:$4 sm:$0xff]  }
 0x185   :  { %v718_v6 = vadd.f32 %v717_v3, %v3714_v59  ;;  %v831_v7 = vadd.f32 %v830_v4, %v3718_v60  ;;  %1276 = vmatprep.mubr.bf16.mxu0 %v930_v62  ;;  %1373 = vmatprep.mubr.bf16.mxu1 %v932_v63  ;;  %v894_v18 = vmax.f32 %v716_v2, 0.0  ;;  %v896_v19 = vmax.f32 %v829_v5, 0.0  ;;  %v3251_v62 = vld [vmem:[#allocation10 + $0xe8] ss:$16 sps:$4 sm:$0xff]   ;;  %v3256_v63 = vld [vmem:[#allocation10 + $0xc4] ss:$16 sps:$4 sm:$0xff]  }
 0x186   :  { %v719_v10 = vpop.f32.mrf.mxu0  ;;  %v832_v11 = vpop.f32.mrf.mxu1  ;;  %1277 = vmatmul.mubr.bf16.gmra.mxu0 %v929_v0  ;;  %1374 = vmatmul.mubr.bf16.gmra.mxu1 %v931_v1  ;;  %v3259_v0 = vld [vmem:[#allocation10 + $0xcc] ss:$16 sps:$4 sm:$0xff]   ;;  %v3254_v1 = vld [vmem:[#allocation10 + $0xc0] ss:$16 sps:$4 sm:$0xff]   ;;  %v3257_v2 = vld [vmem:[#allocation10 + $0xc8] ss:$16 sps:$4 sm:$0xff]  }
 0x187   :  { %v720_v12 = vadd.f32 %v719_v10, %v3707_v57  ;;  %v833_v13 = vadd.f32 %v832_v11, %v3711_v58  ;;  %v897_v14 = vmax.f32 %v718_v6, 0.0  ;;  %v899_v15 = vmax.f32 %v831_v7, 0.0  ;;  %v3262_v3 = vld [vmem:[#allocation10 + $0xa4] ss:$16 sps:$4 sm:$0xff]   ;;  %v3265_v4 = vld [vmem:[#allocation10 + $0xac] ss:$16 sps:$4 sm:$0xff]  }
 0x188   :  { %v723_v16 = vpop.f32.mrf.mxu0  ;;  %v836_v17 = vpop.f32.mrf.mxu1  ;;  %v3260_v5 = vld [vmem:[#allocation10 + $0xa0] ss:$16 sps:$4 sm:$0xff]   ;;  %v3263_v6 = vld [vmem:[#allocation10 + $0xa8] ss:$16 sps:$4 sm:$0xff]   ;;  %v3268_v7 = vld [vmem:[#allocation10 + $0x84] ss:$16 sps:$4 sm:$0xff]  }
 0x189   :  { %v898_v20 = vmax.f32 %v720_v12, 0.0  ;;  %v900_v21 = vmax.f32 %v833_v13, 0.0  ;;  %v933_v28 = vpack.c.bf16 %v897_v14, %v893_v22  ;;  %v935_v29 = vpack.c.bf16 %v899_v15, %v895_v23  ;;  %v3269_v10 = vld [vmem:[#allocation10 + $0x88] ss:$16 sps:$4 sm:$0xff]   ;;  %v3274_v11 = vld [vmem:[#allocation10 + $0x64] ss:$16 sps:$4 sm:$0xff]  }
 0x18a   :  { %v725_v24 = vpop.f32.mrf.mxu0  ;;  %v838_v25 = vpop.f32.mrf.mxu1  ;;  %v724_v36 = vadd.f32 %v723_v16, %v3714_v59  ;;  %v837_v37 = vadd.f32 %v836_v17, %v3718_v60  ;;  %v3277_v12 = vld [vmem:[#allocation10 + $0x6c] ss:$16 sps:$4 sm:$0xff]   ;;  %v3272_v13 = vld [vmem:[#allocation10 + $0x60] ss:$16 sps:$4 sm:$0xff]   ;;  %v3275_v14 = vld [vmem:[#allocation10 + $0x68] ss:$16 sps:$4 sm:$0xff]  }
 0x18b   :  { %v934_v26 = vpack.c.bf16 %v898_v20, %v894_v18  ;;  %v936_v27 = vpack.c.bf16 %v900_v21, %v896_v19  ;;  %v726_v30 = vadd.f32 %v725_v24, %v3707_v57  ;;  %v839_v33 = vadd.f32 %v838_v25, %v3711_v58  ;;  %v3280_v15 = vld [vmem:[#allocation10 + $0x44] ss:$16 sps:$4 sm:$0xff]   ;;  %v3278_v16 = vld [vmem:[#allocation10 + $0x40] ss:$16 sps:$4 sm:$0xff]   ;;  %v3787_v19 = vld [vmem:[%s4039_s4] ss:$0 sm:$0xff] }
 0x18c   :  { %v727_v31 = vpop.f32.mrf.mxu0  ;;  %v840_v32 = vpop.f32.mrf.mxu1  ;;  %v901_v48 = vmax.f32 %v724_v36, 0.0  ;;  %v903_v54 = vmax.f32 %v837_v37, 0.0 }
 0x18d   :  { %v728_v34 = vadd.f32 %v727_v31, %v3714_v59  ;;  %v841_v35 = vadd.f32 %v840_v32, %v3718_v60  ;;  %1284 = vmatprep.mubr.bf16.mxu0 %v934_v26  ;;  %1381 = vmatprep.mubr.bf16.mxu1 %v936_v27  ;;  %v902_v44 = vmax.f32 %v726_v30, 0.0  ;;  %v904_v45 = vmax.f32 %v839_v33, 0.0 }
 0x18e   :  { %v729_v38 = vpop.f32.mrf.mxu0  ;;  %v842_v39 = vpop.f32.mrf.mxu1  ;;  %1285 = vmatmul.mubr.bf16.gmra.mxu0 %v933_v28  ;;  %1382 = vmatmul.mubr.bf16.gmra.mxu1 %v935_v29 }
 0x18f   :  { %v730_v40 = vadd.f32 %v729_v38, %v3707_v57  ;;  %v843_v41 = vadd.f32 %v842_v39, %v3711_v58  ;;  %v905_v42 = vmax.f32 %v728_v34, 0.0  ;;  %v907_v43 = vmax.f32 %v841_v35, 0.0  ;;  %v3250_v57 = vld [vmem:[#allocation10 + $0xe4] ss:$16 sps:$4 sm:$0xff]   ;;  %v3253_v58 = vld [vmem:[#allocation10 + $0xec] ss:$16 sps:$4 sm:$0xff]  }
 0x190   :  { %1732 = vmatprep.subr.bf16.mxu0 %v3250_v57  ;;  %1845 = vmatprep.subr.bf16.mxu1 %v3253_v58 }
 0x191   :  { %v906_v46 = vmax.f32 %v730_v40, 0.0  ;;  %v908_v47 = vmax.f32 %v843_v41, 0.0  ;;  %v937_v56 = vpack.c.bf16 %v905_v42, %v901_v48  ;;  %v939_v60 = vpack.c.bf16 %v907_v43, %v903_v54  ;;  %1733 = vmatpush1.bf16.msra.mxu0 %v3248_v61  ;;  %1846 = vmatpush1.bf16.msra.mxu1 %v3251_v62 }
 0x192   :  { %1734 = vmatprep.subr.bf16.mxu0 %v3256_v63  ;;  %1847 = vmatprep.subr.bf16.mxu1 %v3259_v0 }
 0x193   :  { %v938_v55 = vpack.c.bf16 %v906_v46, %v902_v44  ;;  %v940_v59 = vpack.c.bf16 %v908_v47, %v904_v45 }
 0x195   :  { %1292 = vmatprep.mubr.bf16.mxu0 %v938_v55  ;;  %1389 = vmatprep.mubr.bf16.mxu1 %v940_v59 }
 0x196   :  { %1293 = vmatmul.mubr.bf16.gmra.mxu0 %v937_v56  ;;  %1390 = vmatmul.mubr.bf16.gmra.mxu1 %v939_v60 }
 0x197   :  { %1735 = vmatpush1.bf16.msra.mxu0 %v3254_v1  ;;  %1848 = vmatpush1.bf16.msra.mxu1 %v3257_v2 }
 0x198   :  { %1736 = vmatprep.subr.bf16.mxu0 %v3262_v3  ;;  %1849 = vmatprep.subr.bf16.mxu1 %v3265_v4 }
 0x19b   :  { %1737 = vmatpush1.bf16.msra.mxu0 %v3260_v5  ;;  %1850 = vmatpush1.bf16.msra.mxu1 %v3263_v6 }
 0x19c   :  { %1738 = vmatprep.subr.bf16.mxu0 %v3268_v7  ;;  %1851 = vmatprep.subr.bf16.mxu1 %v3271_v8  ;;  %v3281_v8 = vld [vmem:[#allocation10 + $0x48] ss:$16 sps:$4 sm:$0xff]  }
 0x19f   :  { %1739 = vmatpush1.bf16.msra.mxu0 %v3266_v9  ;;  %1852 = vmatpush1.bf16.msra.mxu1 %v3269_v10  ;;  %v3283_v9 = vld [vmem:[#allocation10 + $0x4c] ss:$16 sps:$4 sm:$0xff]  }
 0x1a0   :  { %1740 = vmatprep.subr.bf16.mxu0 %v3274_v11  ;;  %1853 = vmatprep.subr.bf16.mxu1 %v3277_v12 }
 0x1a3   :  { %1741 = vmatpush1.bf16.msra.mxu0 %v3272_v13  ;;  %1854 = vmatpush1.bf16.msra.mxu1 %v3275_v14 }
 0x1a4   :  { %1742 = vmatprep.subr.bf16.mxu0 %v3280_v15  ;;  %1855 = vmatprep.subr.bf16.mxu1 %v3283_v9 }
 0x1a7   :  { %1743 = vmatpush1.bf16.msra.mxu0 %v3278_v16  ;;  %1856 = vmatpush1.bf16.msra.mxu1 %v3281_v8 }
 0x21e   :  { %v2969_v17 = vpop.f32.mrf.mxu0  ;;  %v3033_v18 = vpop.f32.mrf.mxu1 }
 0x220   :  { %v2970_v20 = vpop.f32.mrf.mxu0  ;;  %v3034_v21 = vpop.f32.mrf.mxu1 }
 0x221   :  { %v2971_v22 = vadd.f32 %v2970_v20, %v2969_v17  ;;  %v3035_v26 = vadd.f32 %v3034_v21, %v3033_v18  ;;  %v3284_v20 = vld [vmem:[#allocation10 + $0x20] ss:$16 sps:$4 sm:$0xff]   ;;  %v3286_v21 = vld [vmem:[#allocation10 + $0x24] ss:$16 sps:$4 sm:$0xff]  }
 0x222   :  { %v2972_v23 = vpop.f32.mrf.mxu0  ;;  %v3036_v24 = vpop.f32.mrf.mxu1  ;;  %1744 = vmatprep.subr.bf16.mxu0 %v3286_v21 }
 0x223   :  { %v1239_v25 = vadd.f32 %v2971_v22, %v3787_v19  ;;  %1745 = vmatpush1.bf16.msra.mxu0 %v3284_v20 }
 0x224   :  { %v2973_v27 = vpop.f32.mrf.mxu0  ;;  %v3037_v28 = vpop.f32.mrf.mxu1 }
 0x225   :  { %v2974_v29 = vadd.f32 %v2973_v27, %v2972_v23  ;;  %v3790_v30 = vadd.f32 %v3035_v26, %v1239_v25  ;;  %v3038_v34 = vadd.f32 %v3037_v28, %v3036_v24 }
 0x226   :  { %v2975_v31 = vpop.f32.mrf.mxu0  ;;  %v3039_v32 = vpop.f32.mrf.mxu1 }
 0x227   :  { %v1242_v33 = vadd.f32 %v2974_v29, %v3787_v19  ;;  %v1398_v35 = vmul.f32 %v3790_v30, %v3790_v30 }
 0x228   :  { %v2976_v36 = vpop.f32.mrf.mxu0  ;;  %v3040_v37 = vpop.f32.mrf.mxu1 }
 0x229   :  { %v3795_v38 = vadd.f32 %v3038_v34, %v1242_v33  ;;  %v2977_v39 = vadd.f32 %v2976_v36, %v2975_v31  ;;  %1414 = vadd.xlane.f32.xlu0 %v1398_v35  ;;  %v3041_v43 = vadd.f32 %v3040_v37, %v3039_v32  ;;  %v3287_v32 = vld [vmem:[#allocation10 + $0x28] ss:$16 sps:$4 sm:$0xff]   ;;  %v3289_v33 = vld [vmem:[#allocation10 + $0x2c] ss:$16 sps:$4 sm:$0xff]  }
 0x22a   :  { %v2978_v40 = vpop.f32.mrf.mxu0  ;;  %v3042_v41 = vpop.f32.mrf.mxu1  ;;  %1857 = vmatprep.subr.bf16.mxu1 %v3289_v33 }
 0x22b   :  { %v1247_v42 = vadd.f32 %v2977_v39, %v3787_v19  ;;  %v1399_v44 = vmul.f32 %v3795_v38, %v3795_v38  ;;  %1858 = vmatpush1.bf16.msra.mxu1 %v3287_v32 }
 0x22c   :  { %v2979_v45 = vpop.f32.mrf.mxu0  ;;  %v3043_v46 = vpop.f32.mrf.mxu1 }
 0x22d   :  { %v2980_v47 = vadd.f32 %v2979_v45, %v2978_v40  ;;  %1416 = vadd.xlane.f32.xlu0 %v1399_v44  ;;  %v3800_v48 = vadd.f32 %v3041_v43, %v1247_v42  ;;  %v3044_v56 = vadd.f32 %v3043_v46, %v3042_v41  ;;  %v3290_v44 = vld [vmem:[#allocation10] ss:$16 sps:$4 sm:$0xff]   ;;  %v3292_v45 = vld [vmem:[#allocation10 + $0x4] ss:$16 sps:$4 sm:$0xff]  }
 0x22e   :  { %v2981_v54 = vpop.f32.mrf.mxu0  ;;  %v3045_v55 = vpop.f32.mrf.mxu1  ;;  %1746 = vmatprep.subr.bf16.mxu0 %v3292_v45 }
 0x22f   :  { %v1250_v59 = vadd.f32 %v2980_v47, %v3787_v19  ;;  %v1400_v60 = vmul.f32 %v3800_v48, %v3800_v48  ;;  %1747 = vmatpush1.bf16.msra.mxu0 %v3290_v44 }
 0x230   :  { %v2982_v61 = vpop.f32.mrf.mxu0  ;;  %v3046_v57 = vpop.f32.mrf.mxu1 }
 0x231   :  { %v3805_v62 = vadd.f32 %v3044_v56, %v1250_v59  ;;  %v2983_v58 = vadd.f32 %v2982_v61, %v2981_v54  ;;  %1418 = vadd.xlane.f32.xlu1 %v1400_v60  ;;  %v3047_v2 = vadd.f32 %v3046_v57, %v3045_v55 }
 0x232   :  { %v2984_v63 = vpop.f32.mrf.mxu0  ;;  %v3048_v0 = vpop.f32.mrf.mxu1 }
 0x233   :  { %v1255_v1 = vadd.f32 %v2983_v58, %v3787_v19  ;;  %v1401_v3 = vmul.f32 %v3805_v62, %v3805_v62  ;;  %v3293_v58 = vld [vmem:[#allocation10 + $0x8] ss:$16 sps:$4 sm:$0xff]  }
 0x234   :  { %v2985_v4 = vpop.f32.mrf.mxu0  ;;  %v3049_v5 = vpop.f32.mrf.mxu1 }
 0x235   :  { %v3810_v6 = vadd.f32 %v3047_v2, %v1255_v1  ;;  %v2986_v7 = vadd.f32 %v2985_v4, %v2984_v63  ;;  %1420 = vadd.xlane.f32.xlu1 %v1401_v3  ;;  %v3050_v13 = vadd.f32 %v3049_v5, %v3048_v0  ;;  %v3295_v63 = vld [vmem:[#allocation10 + $0xc] ss:$16 sps:$4 sm:$0xff]  }
 0x236   :  { %v2987_v10 = vpop.f32.mrf.mxu0  ;;  %v3051_v11 = vpop.f32.mrf.mxu1  ;;  %1859 = vmatprep.subr.bf16.mxu1 %v3295_v63 }
 0x237   :  { %v1258_v12 = vadd.f32 %v2986_v7, %v3787_v19  ;;  %v1402_v14 = vmul.f32 %v3810_v6, %v3810_v6  ;;  %1860 = vmatpush1.bf16.msra.mxu1 %v3293_v58 }
 0x238   :  { %v2988_v15 = vpop.f32.mrf.mxu0  ;;  %v3052_v16 = vpop.f32.mrf.mxu1 }
 0x239   :  { %v3815_v17 = vadd.f32 %v3050_v13, %v1258_v12  ;;  %v2989_v18 = vadd.f32 %v2988_v15, %v2987_v10  ;;  %1422 = vadd.xlane.f32.xlu0 %v1402_v14  ;;  %v3053_v25 = vadd.f32 %v3052_v16, %v3051_v11  ;;  %v3608_v12 = vmov 0  }
 0x23a   :  { %v2990_v22 = vpop.f32.mrf.mxu0  ;;  %v3054_v23 = vpop.f32.mrf.mxu1  ;;  %1764 = vmatprep.mubr.bf16.mxu0 %v3608_v12  ;;  %1877 = vmatprep.mubr.bf16.mxu1 %v3608_v12 }
 0x23b   :  { %v1263_v24 = vadd.f32 %v2989_v18, %v3787_v19  ;;  %v1403_v26 = vmul.f32 %v3815_v17, %v3815_v17 }
 0x23c   :  { %v2991_v27 = vpop.f32.mrf.mxu0  ;;  %v3055_v28 = vpop.f32.mrf.mxu1 }
 0x23d   :  { %v3820_v29 = vadd.f32 %v3053_v25, %v1263_v24  ;;  %v2992_v31 = vadd.f32 %v2991_v27, %v2990_v22  ;;  %1424 = vadd.xlane.f32.xlu1 %v1403_v26  ;;  %v3056_v37 = vadd.f32 %v3055_v28, %v3054_v23 }
 0x23e   :  { %v2993_v34 = vpop.f32.mrf.mxu0  ;;  %v3057_v35 = vpop.f32.mrf.mxu1 }
 0x23f   :  { %v1266_v36 = vadd.f32 %v2992_v31, %v3787_v19  ;;  %v1404_v39 = vmul.f32 %v3820_v29, %v3820_v29 }
 0x240   :  { %v2994_v40 = vpop.f32.mrf.mxu0  ;;  %v3058_v41 = vpop.f32.mrf.mxu1 }
 0x241   :  { %v3825_v42 = vadd.f32 %v3056_v37, %v1266_v36  ;;  %v2995_v43 = vadd.f32 %v2994_v40, %v2993_v34  ;;  %1426 = vadd.xlane.f32.xlu0 %v1404_v39  ;;  %v3059_v55 = vadd.f32 %v3058_v41, %v3057_v35 }
 0x242   :  { %v2996_v46 = vpop.f32.mrf.mxu0  ;;  %v3060_v47 = vpop.f32.mrf.mxu1 }
 0x243   :  { %v1271_v54 = vadd.f32 %v2995_v43, %v3787_v19  ;;  %v1405_v59 = vmul.f32 %v3825_v42, %v3825_v42 }
 0x244   :  { %v2997_v56 = vpop.f32.mrf.mxu0  ;;  %v3061_v60 = vpop.f32.mrf.mxu1 }
 0x245   :  { %v3830_v61 = vadd.f32 %v3059_v55, %v1271_v54  ;;  %v2998_v57 = vadd.f32 %v2997_v56, %v2996_v46  ;;  %1428 = vadd.xlane.f32.xlu1 %v1405_v59  ;;  %v3062_v3 = vadd.f32 %v3061_v60, %v3060_v47 }
 0x246   :  { %v2999_v0 = vpop.f32.mrf.mxu0  ;;  %v3063_v1 = vpop.f32.mrf.mxu1 }
 0x247   :  { %v1274_v2 = vadd.f32 %v2998_v57, %v3787_v19  ;;  %v1406_v4 = vmul.f32 %v3830_v61, %v3830_v61 }
 0x248   :  { %v3000_v5 = vpop.f32.mrf.mxu0  ;;  %v3064_v7 = vpop.f32.mrf.mxu1 }
 0x249   :  { %v3835_v8 = vadd.f32 %v3062_v3, %v1274_v2  ;;  %v3001_v9 = vadd.f32 %v3000_v5, %v2999_v0  ;;  %1430 = vadd.xlane.f32.xlu0 %v1406_v4  ;;  %v3065_v14 = vadd.f32 %v3064_v7, %v3063_v1 }
 0x24a   :  { %v3002_v10 = vpop.f32.mrf.mxu0  ;;  %v3066_v11 = vpop.f32.mrf.mxu1 }
 0x24b   :  { %v1279_v13 = vadd.f32 %v3001_v9, %v3787_v19  ;;  %v1407_v15 = vmul.f32 %v3835_v8, %v3835_v8 }
 0x24c   :  { %v3003_v16 = vpop.f32.mrf.mxu0  ;;  %v3067_v18 = vpop.f32.mrf.mxu1 }
 0x24d   :  { %v3842_v20 = vadd.f32 %v3065_v14, %v1279_v13  ;;  %v3004_v21 = vadd.f32 %v3003_v16, %v3002_v10  ;;  %1432 = vadd.xlane.f32.xlu1 %v1407_v15  ;;  %v3068_v25 = vadd.f32 %v3067_v18, %v3066_v11  ;;  %v3298_v14 = vld [vmem:[#allocation11 + $0x74] ss:$8 sps:$4 sm:$0xff]  }
 0x24e   :  { %v3005_v22 = vpop.f32.mrf.mxu0  ;;  %v3069_v23 = vpop.f32.mrf.mxu1  ;;  %v3301_v15 = vld [vmem:[#allocation11 + $0x174] ss:$8 sps:$4 sm:$0xff]   ;;  %2450 = vmatprep.subr.bf16.mxu0 %v3298_v14 }
 0x24f   :  { %v1282_v24 = vadd.f32 %v3004_v21, %v3787_v19  ;;  %v1408_v26 = vmul.f32 %v3842_v20, %v3842_v20  ;;  %2563 = vmatprep.subr.bf16.mxu1 %v3301_v15 }
 0x250   :  { %v3006_v27 = vpop.f32.mrf.mxu0  ;;  %v3070_v28 = vpop.f32.mrf.mxu1 }
 0x251   :  { %v3847_v31 = vadd.f32 %v3068_v25, %v1282_v24  ;;  %v3007_v32 = vadd.f32 %v3006_v27, %v3005_v22  ;;  %1434 = vadd.xlane.f32.xlu0 %v1408_v26  ;;  %v3071_v36 = vadd.f32 %v3070_v28, %v3069_v23 }
 0x252   :  { %v3008_v33 = vpop.f32.mrf.mxu0  ;;  %v3072_v34 = vpop.f32.mrf.mxu1 }
 0x253   :  { %v1287_v35 = vadd.f32 %v3007_v32, %v3787_v19  ;;  %v1409_v37 = vmul.f32 %v3847_v31, %v3847_v31 }
 0x254   :  { %v3009_v39 = vpop.f32.mrf.mxu0  ;;  %v3073_v40 = vpop.f32.mrf.mxu1 }
 0x255   :  { %v3852_v41 = vadd.f32 %v3071_v36, %v1287_v35  ;;  %v3010_v43 = vadd.f32 %v3009_v39, %v3008_v33  ;;  %1436 = vadd.xlane.f32.xlu1 %v1409_v37  ;;  %v3074_v47 = vadd.f32 %v3073_v40, %v3072_v34  ;;  %v3296_v39 = vld [vmem:[#allocation11 + $0x70] ss:$8 sps:$4 sm:$0xff]  }
 0x256   :  { %v3011_v44 = vpop.f32.mrf.mxu0  ;;  %v3075_v45 = vpop.f32.mrf.mxu1  ;;  %v3299_v40 = vld [vmem:[#allocation11 + $0x170] ss:$8 sps:$4 sm:$0xff]  }
 0x257   :  { %v1290_v46 = vadd.f32 %v3010_v43, %v3787_v19  ;;  %v1410_v54 = vmul.f32 %v3852_v41, %v3852_v41 }
 0x258   :  { %v3012_v55 = vpop.f32.mrf.mxu0  ;;  %v3076_v59 = vpop.f32.mrf.mxu1 }
 0x259   :  { %v3857_v56 = vadd.f32 %v3074_v47, %v1290_v46  ;;  %v3013_v60 = vadd.f32 %v3012_v55, %v3011_v44  ;;  %1438 = vadd.xlane.f32.xlu0 %v1410_v54  ;;  %v3077_v0 = vadd.f32 %v3076_v59, %v3075_v45  ;;  %v3304_v45 = vld [vmem:[#allocation11 + $0x64] ss:$8 sps:$4 sm:$0xff]   ;;  %v3305_v54 = vld [vmem:[#allocation11 + $0x160] ss:$8 sps:$4 sm:$0xff]  }
 0x25a   :  { %v3014_v57 = vpop.f32.mrf.mxu0  ;;  %v3078_v58 = vpop.f32.mrf.mxu1  ;;  %v3307_v46 = vld [vmem:[#allocation11 + $0x164] ss:$8 sps:$4 sm:$0xff]  }
 0x25b   :  { %v1295_v63 = vadd.f32 %v3013_v60, %v3787_v19  ;;  %v1411_v1 = vmul.f32 %v3857_v56, %v3857_v56  ;;  %v3310_v60 = vld [vmem:[#allocation11 + $0x54] ss:$8 sps:$4 sm:$0xff]  }
 0x25c   :  { %v3015_v2 = vpop.f32.mrf.mxu0  ;;  %v3079_v3 = vpop.f32.mrf.mxu1 }
 0x25d   :  { %v3862_v4 = vadd.f32 %v3077_v0, %v1295_v63  ;;  %v3016_v5 = vadd.f32 %v3015_v2, %v3014_v57  ;;  %1440 = vadd.xlane.f32.xlu1 %v1411_v1  ;;  %v3080_v9 = vadd.f32 %v3079_v3, %v3078_v58  ;;  %v3313_v57 = vld [vmem:[#allocation11 + $0x154] ss:$8 sps:$4 sm:$0xff]   ;;  %v3308_v0 = vld [vmem:[#allocation11 + $0x50] ss:$8 sps:$4 sm:$0xff]  }
 0x25e   :  { %v3311_v1 = vld [vmem:[#allocation11 + $0x150] ss:$8 sps:$4 sm:$0xff]  }
 0x25f   :  { %v1298_v7 = vadd.f32 %v3016_v5, %v3787_v19  ;;  %v1412_v10 = vmul.f32 %v3862_v4, %v3862_v4  ;;  %v3316_v5 = vld [vmem:[#allocation11 + $0x44] ss:$8 sps:$4 sm:$0xff]  }
 0x261   :  { %v3867_v11 = vadd.f32 %v3080_v9, %v1298_v7  ;;  %1442 = vadd.xlane.f32.xlu0 %v1412_v10  ;;  %v3319_v7 = vld [vmem:[#allocation11 + $0x144] ss:$8 sps:$4 sm:$0xff]  }
 0x263   :  { %v1413_v13 = vmul.f32 %v3867_v11, %v3867_v11 }
 0x265   :  { %1444 = vadd.xlane.f32.xlu1 %v1413_v13  ;;  %v3317_v13 = vld [vmem:[#allocation11 + $0x140] ss:$8 sps:$4 sm:$0xff]  }
 0x2b2   :  { %v1415_v16 = vpop.xlane.xlu0 %1414 }
 0x2b3   :  { %v1446_v18 = vmax.f32 %v1415_v16, 1e-24  ;;  %v3322_v16 = vld [vmem:[#allocation11 + $0x34] ss:$8 sps:$4 sm:$0xff]  }
 0x2b5   :  { %3392 = vrsqrt.f32 %v1446_v18  ;;  %v3325_v18 = vld [vmem:[#allocation11 + $0x134] ss:$8 sps:$4 sm:$0xff]  }
 0x2b6   :  { %v1417_v21 = vpop.xlane.xlu0 %1416 }
 0x2b7   :  { %v1447_v19 = vmax.f32 %v1417_v21, 1e-24 }
 0x2b9   :  { %3394 = vrsqrt.f32 %v1447_v19 }
 0x2ba   :  { %v1419_v22 = vpop.xlane.xlu1 %1418 }
 0x2bb   :  { %v1448_v23 = vmax.f32 %v1419_v22, 1e-24  ;;  %v3320_v22 = vld [vmem:[#allocation11 + $0x30] ss:$8 sps:$4 sm:$0xff]  }
 0x2bd   :  { %3396 = vrsqrt.f32 %v1448_v23  ;;  %v3323_v23 = vld [vmem:[#allocation11 + $0x130] ss:$8 sps:$4 sm:$0xff]  }
 0x2be   :  { %v1421_v24 = vpop.xlane.xlu1 %1420 }
 0x2bf   :  { %v1449_v25 = vmax.f32 %v1421_v24, 1e-24 }
 0x2c1   :  { %3398 = vrsqrt.f32 %v1449_v25 }
 0x2c2   :  { %v3393_v26 = vpop.eup %3392  ;;  %v1423_v27 = vpop.xlane.xlu0 %1422 }
 0x2c3   :  { %v1450_v28 = vmax.f32 %v1423_v27, 1e-24  ;;  %v1478_v32 = vmul.f32 %v3393_v26, %v3790_v30  ;;  %v3328_v26 = vld [vmem:[#allocation11 + $0x24] ss:$8 sps:$4 sm:$0xff]  }
 0x2c4   :  { %v3331_v27 = vld [vmem:[#allocation11 + $0x124] ss:$8 sps:$4 sm:$0xff]  }
 0x2c5   :  { %3400 = vrsqrt.f32 %v1450_v28  ;;  %1494 = vst [vmem:[#allocation14] sm:$0xff] %v1478_v32 }
 0x2c6   :  { %v3395_v33 = vpop.eup %3394  ;;  %v1425_v34 = vpop.xlane.xlu1 %1424 }
 0x2c7   :  { %v1451_v35 = vmax.f32 %v1425_v34, 1e-24  ;;  %v1479_v36 = vmul.f32 %v3395_v33, %v3795_v38  ;;  %v3302_v38 = vld [vmem:[#allocation11 + $0x60] ss:$8 sps:$4 sm:$0xff]  }
 0x2c8   :  { %v3329_v33 = vld [vmem:[#allocation11 + $0x120] ss:$8 sps:$4 sm:$0xff]  }
 0x2c9   :  { %3402 = vrsqrt.f32 %v1451_v35  ;;  %1495 = vst [vmem:[#allocation14 + $0x8] sm:$0xff] %v1479_v36  ;;  %v1510_v37 = vpack.c.bf16 %v1479_v36, %v1478_v32  ;;  %v3334_v36 = vld [vmem:[#allocation11 + $0x14] ss:$8 sps:$4 sm:$0xff]  }
 0x2ca   :  { %v3397_v43 = vpop.eup %3396  ;;  %v1427_v44 = vpop.xlane.xlu0 %1426 }
 0x2cb   :  { %v1452_v47 = vmax.f32 %v1427_v44, 1e-24  ;;  %1765 = vmatmul.mubr.bf16.vlgmr.msra.gmra.mxu0 %v1510_v37  ;;  %1878 = vmatmul.mubr.bf16.vlgmr.msra.gmra.mxu1 %v1510_v37  ;;  %v1480_v30 = vmul.f32 %v3397_v43, %v3800_v48  ;;  %v3337_v37 = vld [vmem:[#allocation11 + $0x114] ss:$8 sps:$4 sm:$0xff]   ;;  %v3332_v43 = vld [vmem:[#allocation11 + $0x10] ss:$8 sps:$4 sm:$0xff]  }
 0x2cc   :  { %1774 = vmatprep.mubr.bf16.mxu0 %v3608_v12  ;;  %1887 = vmatprep.mubr.bf16.mxu1 %v3608_v12  ;;  %v3335_v44 = vld [vmem:[#allocation11 + $0x110] ss:$8 sps:$4 sm:$0xff]  }
 0x2cd   :  { %3404 = vrsqrt.f32 %v1452_v47  ;;  %1496 = vst [vmem:[#allocation14 + $0x10] sm:$0xff] %v1480_v30  ;;  %2451 = vmatpush1.bf16.msra.mxu0 %v3296_v39  ;;  %2564 = vmatpush1.bf16.msra.mxu1 %v3299_v40  ;;  %v3340_v47 = vld [vmem:[#allocation11 + $0x4] ss:$8 sps:$4 sm:$0xff]  }
 0x2ce   :  { %v3399_v55 = vpop.eup %3398  ;;  %v1429_v59 = vpop.xlane.xlu1 %1428  ;;  %2452 = vmatprep.subr.bf16.mxu0 %v3304_v45  ;;  %2565 = vmatprep.subr.bf16.mxu1 %v3307_v46 }
 0x2cf   :  { %v1453_v58 = vmax.f32 %v1429_v59, 1e-24  ;;  %v1481_v63 = vmul.f32 %v3399_v55, %v3805_v62  ;;  %v3314_v62 = vld [vmem:[#allocation11 + $0x40] ss:$8 sps:$4 sm:$0xff]  }
 0x2d0   :  { %v3341_v55 = vld [vmem:[#allocation11 + $0x100] ss:$8 sps:$4 sm:$0xff]  }
 0x2d1   :  { %3406 = vrsqrt.f32 %v1453_v58  ;;  %1497 = vst [vmem:[#allocation14 + $0x18] sm:$0xff] %v1481_v63  ;;  %v1511_v48 = vpack.c.bf16 %v1481_v63, %v1480_v30  ;;  %2453 = vmatpush1.bf16.msra.mxu0 %v3302_v38  ;;  %2566 = vmatpush1.bf16.msra.mxu1 %v3305_v54  ;;  %v3343_v30 = vld [vmem:[#allocation11 + $0x104] ss:$8 sps:$4 sm:$0xff]   ;;  %v3349_v58 = vld [vmem:[#allocation11 + $0x1f4] ss:$8 sps:$4 sm:$0xff]  }
 0x2d2   :  { %v3401_v2 = vpop.eup %3400  ;;  %v1431_v3 = vpop.xlane.xlu0 %1430  ;;  %2454 = vmatprep.subr.bf16.mxu0 %v3310_v60  ;;  %2567 = vmatprep.subr.bf16.mxu1 %v3313_v57  ;;  %v3346_v57 = vld [vmem:[#allocation11 + $0xf4] ss:$8 sps:$4 sm:$0xff]  }
 0x2d3   :  { %v1454_v9 = vmax.f32 %v1431_v3, 1e-24  ;;  %1775 = vmatmul.mubr.bf16.gmra.mxu0 %v1511_v48  ;;  %1888 = vmatmul.mubr.bf16.gmra.mxu1 %v1511_v48  ;;  %v1482_v10 = vmul.f32 %v3401_v2, %v3810_v6 }
 0x2d4   :  { %1784 = vmatprep.mubr.bf16.mxu0 %v3608_v12  ;;  %1897 = vmatprep.mubr.bf16.mxu1 %v3608_v12 }
 0x2d5   :  { %3408 = vrsqrt.f32 %v1454_v9  ;;  %1498 = vst [vmem:[#allocation14 + $0x20] sm:$0xff] %v1482_v10  ;;  %2455 = vmatpush1.bf16.msra.mxu0 %v3308_v0  ;;  %2568 = vmatpush1.bf16.msra.mxu1 %v3311_v1  ;;  %v3344_v0 = vld [vmem:[#allocation11 + $0xf0] ss:$8 sps:$4 sm:$0xff]  }
 0x2d6   :  { %v3403_v14 = vpop.eup %3402  ;;  %v1433_v15 = vpop.xlane.xlu1 %1432  ;;  %2456 = vmatprep.subr.bf16.mxu0 %v3316_v5  ;;  %2569 = vmatprep.subr.bf16.mxu1 %v3319_v7  ;;  %v3347_v1 = vld [vmem:[#allocation11 + $0x1f0] ss:$8 sps:$4 sm:$0xff]   ;;  %v3352_v5 = vld [vmem:[#allocation11 + $0xe4] ss:$8 sps:$4 sm:$0xff]  }
 0x2d7   :  { %v1455_v21 = vmax.f32 %v1433_v15, 1e-24  ;;  %v1483_v19 = vmul.f32 %v3403_v14, %v3815_v17  ;;  %v3326_v17 = vld [vmem:[#allocation11 + $0x20] ss:$8 sps:$4 sm:$0xff]   ;;  %v3355_v7 = vld [vmem:[#allocation11 + $0x1e4] ss:$8 sps:$4 sm:$0xff]  }
 0x2d8   :  { %v3358_v15 = vld [vmem:[#allocation11 + $0xd4] ss:$8 sps:$4 sm:$0xff]  }
 0x2d9   :  { %3410 = vrsqrt.f32 %v1455_v21  ;;  %1499 = vst [vmem:[#allocation14 + $0x28] sm:$0xff] %v1483_v19  ;;  %v1512_v6 = vpack.c.bf16 %v1483_v19, %v1482_v10  ;;  %2457 = vmatpush1.bf16.msra.mxu0 %v3314_v62  ;;  %2570 = vmatpush1.bf16.msra.mxu1 %v3317_v13  ;;  %v3353_v62 = vld [vmem:[#allocation11 + $0x1e0] ss:$8 sps:$4 sm:$0xff]   ;;  %v3356_v19 = vld [vmem:[#allocation11 + $0xd0] ss:$8 sps:$4 sm:$0xff]  }
 0x2da   :  { %v3405_v24 = vpop.eup %3404  ;;  %v1435_v25 = vpop.xlane.xlu0 %1434  ;;  %2458 = vmatprep.subr.bf16.mxu0 %v3322_v16  ;;  %2571 = vmatprep.subr.bf16.mxu1 %v3325_v18  ;;  %v3361_v16 = vld [vmem:[#allocation11 + $0x1d4] ss:$8 sps:$4 sm:$0xff]  }
 0x2db   :  { %v1456_v28 = vmax.f32 %v1435_v25, 1e-24  ;;  %1785 = vmatmul.mubr.bf16.gmra.mxu0 %v1512_v6  ;;  %1898 = vmatmul.mubr.bf16.gmra.mxu1 %v1512_v6  ;;  %v1484_v32 = vmul.f32 %v3405_v24, %v3820_v29  ;;  %v3359_v6 = vld [vmem:[#allocation11 + $0x1d0] ss:$8 sps:$4 sm:$0xff]   ;;  %v3367_v24 = vld [vmem:[#allocation11 + $0x1c4] ss:$8 sps:$4 sm:$0xff]  }
 0x2dc   :  { %1794 = vmatprep.mubr.bf16.mxu0 %v3608_v12  ;;  %1907 = vmatprep.mubr.bf16.mxu1 %v3608_v12 }
 0x2dd   :  { %3412 = vrsqrt.f32 %v1456_v28  ;;  %1500 = vst [vmem:[#allocation14 + $0x30] sm:$0xff] %v1484_v32  ;;  %2459 = vmatpush1.bf16.msra.mxu0 %v3320_v22  ;;  %2572 = vmatpush1.bf16.msra.mxu1 %v3323_v23  ;;  %v3364_v23 = vld [vmem:[#allocation11 + $0xc4] ss:$8 sps:$4 sm:$0xff]   ;;  %v3370_v28 = vld [vmem:[#allocation11 + $0xb4] ss:$8 sps:$4 sm:$0xff]  }
 0x2de   :  { %v3407_v34 = vpop.eup %3406  ;;  %v1437_v35 = vpop.xlane.xlu1 %1436  ;;  %2460 = vmatprep.subr.bf16.mxu0 %v3328_v26  ;;  %2573 = vmatprep.subr.bf16.mxu1 %v3331_v27  ;;  %v3365_v26 = vld [vmem:[#allocation11 + $0x1c0] ss:$8 sps:$4 sm:$0xff]  }
 0x2df   :  { %v1457_v39 = vmax.f32 %v1437_v35, 1e-24  ;;  %v1485_v40 = vmul.f32 %v3407_v34, %v3825_v42  ;;  %v3338_v42 = vld [vmem:[#allocation11] ss:$8 sps:$4 sm:$0xff]   ;;  %v3371_v34 = vld [vmem:[#allocation11 + $0x1b0] ss:$8 sps:$4 sm:$0xff]  }
 0x2e1   :  { %3414 = vrsqrt.f32 %v1457_v39  ;;  %1501 = vst [vmem:[#allocation14 + $0x38] sm:$0xff] %v1485_v40  ;;  %v1513_v29 = vpack.c.bf16 %v1485_v40, %v1484_v32  ;;  %2461 = vmatpush1.bf16.msra.mxu0 %v3326_v17  ;;  %2574 = vmatpush1.bf16.msra.mxu1 %v3329_v33  ;;  %v3373_v32 = vld [vmem:[#allocation11 + $0x1b4] ss:$8 sps:$4 sm:$0xff]   ;;  %v3376_v40 = vld [vmem:[#allocation11 + $0xa4] ss:$8 sps:$4 sm:$0xff]  }
 0x2e2   :  { %v3409_v45 = vpop.eup %3408  ;;  %v1439_v46 = vpop.xlane.xlu0 %1438  ;;  %2462 = vmatprep.subr.bf16.mxu0 %v3334_v36  ;;  %2575 = vmatprep.subr.bf16.mxu1 %v3337_v37 }
 0x2e3   :  { %v1458_v38 = vmax.f32 %v1439_v46, 1e-24  ;;  %1795 = vmatmul.mubr.bf16.gmra.mxu0 %v1513_v29  ;;  %1908 = vmatmul.mubr.bf16.gmra.mxu1 %v1513_v29  ;;  %v1486_v54 = vmul.f32 %v3409_v45, %v3830_v61  ;;  %v3379_v29 = vld [vmem:[#allocation11 + $0x1a4] ss:$8 sps:$4 sm:$0xff]   ;;  %v3380_v45 = vld [vmem:[#allocation11 + $0x90] ss:$8 sps:$4 sm:$0xff]  }
 0x2e4   :  { %1804 = vmatprep.mubr.bf16.mxu0 %v3608_v12  ;;  %1917 = vmatprep.mubr.bf16.mxu1 %v3608_v12  ;;  %v3383_v46 = vld [vmem:[#allocation11 + $0x190] ss:$8 sps:$4 sm:$0xff]  }
 0x2e5   :  { %3416 = vrsqrt.f32 %v1458_v38  ;;  %1502 = vst [vmem:[#allocation14 + $0x40] sm:$0xff] %v1486_v54  ;;  %2463 = vmatpush1.bf16.msra.mxu0 %v3332_v43  ;;  %2576 = vmatpush1.bf16.msra.mxu1 %v3335_v44  ;;  %v3374_v43 = vld [vmem:[#allocation11 + $0xa0] ss:$8 sps:$4 sm:$0xff]  }
 0x2e6   :  { %v3411_v59 = vpop.eup %3410  ;;  %v1441_v60 = vpop.xlane.xlu1 %1440  ;;  %2464 = vmatprep.subr.bf16.mxu0 %v3340_v47  ;;  %2577 = vmatprep.subr.bf16.mxu1 %v3343_v30  ;;  %v3377_v44 = vld [vmem:[#allocation11 + $0x1a0] ss:$8 sps:$4 sm:$0xff]   ;;  %v3391_v47 = vld [vmem:[#allocation11 + $0x184] ss:$8 sps:$4 sm:$0xff]  }
 0x2e7   :  { %v1459_v63 = vmax.f32 %v1441_v60, 1e-24  ;;  %v1487_v48 = vmul.f32 %v3411_v59, %v3835_v8  ;;  %v3350_v8 = vld [vmem:[#allocation11 + $0xe0] ss:$8 sps:$4 sm:$0xff]  }
 0x2e8   :  { %v3386_v30 = vld [vmem:[#allocation11 + $0x80] ss:$8 sps:$4 sm:$0xff]  }
 0x2e9   :  { %3418 = vrsqrt.f32 %v1459_v63  ;;  %1503 = vst [vmem:[#allocation14 + $0x48] sm:$0xff] %v1487_v48  ;;  %v1514_v61 = vpack.c.bf16 %v1487_v48, %v1486_v54  ;;  %2465 = vmatpush1.bf16.msra.mxu0 %v3338_v42  ;;  %2578 = vmatpush1.bf16.msra.mxu1 %v3341_v55  ;;  %v3389_v38 = vld [vmem:[#allocation11 + $0x180] ss:$8 sps:$4 sm:$0xff]   ;;  %v1550_v54 = vld [vmem:[%s4041_s6] sm:$0xf]  ;;  %s3609_s6 = smov [#allocation14]  }
 0x2ea   :  { %v3413_v2 = vpop.eup %3412  ;;  %v1443_v3 = vpop.xlane.xlu0 %1442  ;;  %2466 = vmatprep.subr.bf16.mxu0 %v3346_v57  ;;  %2579 = vmatprep.subr.bf16.mxu1 %v3349_v58  ;;  %v3905_v59 = vrot.slane %v1550_v54, %v3699_v50  ;;  %v3909_v60 = vrot.slane %v1550_v54, %v213_v51  ;;  %v3912_v57 = vrot.slane %v1550_v54, %v3703_v52  ;;  %s2725_s28 = sshll.u32 %s3609_s6, 4  ;;  %s2726_s28 = int_to_ptr.vmem [resolvable:$true] %s2725_s28 }
 0x2eb   :  { %v1460_v9 = vmax.f32 %v1443_v3, 1e-24  ;;  %1805 = vmatmul.mubr.bf16.gmra.mxu0 %v1514_v61  ;;  %1918 = vmatmul.mubr.bf16.gmra.mxu1 %v1514_v61  ;;  %v1488_v10 = vmul.f32 %v3413_v2, %v3842_v20  ;;  %v3916_v58 = vrot.slane %v1550_v54, %v209_v53  ;;  %s3544_s1 = scalar_lea.vmem %s2726_s28, 2048  ;;  %p3549_p3 = scmp.lt.s32.totalorder %s2726_s28, %s2726_s28 }
 0x2ec   :  { %1814 = vmatprep.mubr.bf16.mxu0 %v3608_v12  ;;  %1927 = vmatprep.mubr.bf16.mxu1 %v3608_v12  ;;  %p3545_p2 = scmp.ne.s32.totalorder %s2726_s28, %s3544_s1  ;;  %p3550_p4 = scmp.lt.s32.totalorder %s3544_s1, %s3544_s1 }
 0x2ed   :  { %3420 = vrsqrt.f32 %v1460_v9  ;;  %1504 = vst [vmem:[#allocation14 + $0x50] sm:$0xff] %v1488_v10  ;;  %2467 = vmatpush2.bf16.msra.mxu0 %v3344_v0  ;;  %2580 = vmatpush2.bf16.msra.mxu1 %v3347_v1 }
 0x2ee   :  { %v3415_v13 = vpop.eup %3414  ;;  %v1445_v14 = vpop.xlane.xlu1 %1444  ;;  %2468 = vmatprep.subr.bf16.mxu0 %v3352_v5  ;;  %2581 = vmatprep.subr.bf16.mxu1 %v3355_v7  ;;  %p3551_p5 = por %p3550_p4, %p3549_p3 }
 0x2ef   :  { %v1461_v18 = vmax.f32 %v1445_v14, 1e-24  ;;  %v1489_v21 = vmul.f32 %v3415_v13, %v3847_v31  ;;  %v3362_v31 = vld [vmem:[#allocation11 + $0xc0] ss:$8 sps:$4 sm:$0xff]  }
 0x2f0   :  { %p3552_p6 = pnand %p3551_p5, %p3545_p2 }
 0x2f1   :  { %3422 = vrsqrt.f32 %v1461_v18  ;;  %1505 = vst [vmem:[#allocation14 + $0x58] sm:$0xff] %v1489_v21  ;;  %v1515_v20 = vpack.c.bf16 %v1489_v21, %v1488_v10  ;;  %2469 = vmatpush2.bf16.msra.mxu0 %v3350_v8  ;;  %2582 = vmatpush2.bf16.msra.mxu1 %v3353_v62 }
 0x2f2   :  { %v3417_v22 = vpop.eup %3416  ;;  %2470 = vmatprep.subr.bf16.mxu0 %v3358_v15  ;;  %2583 = vmatprep.subr.bf16.mxu1 %v3361_v16 }
 0x2f3   :  { %1815 = vmatmul.mubr.bf16.gmra.mxu0 %v1515_v20  ;;  %1928 = vmatmul.mubr.bf16.gmra.mxu1 %v1515_v20  ;;  %v1490_v25 = vmul.f32 %v3417_v22, %v3852_v41  ;;  %v3368_v41 = vld [vmem:[#allocation11 + $0xb0] ss:$8 sps:$4 sm:$0xff]  }
 0x2f4   :  { %1824 = vmatprep.mubr.bf16.mxu0 %v3608_v12  ;;  %1937 = vmatprep.mubr.bf16.mxu1 %v3608_v12 }
 0x2f5   :  { %1506 = vst [vmem:[#allocation14 + $0x60] sm:$0xff] %v1490_v25  ;;  %2471 = vmatpush2.bf16.msra.mxu0 %v3356_v19  ;;  %2584 = vmatpush2.bf16.msra.mxu1 %v3359_v6 }
 0x2f6   :  { %v3419_v27 = vpop.eup %3418  ;;  %2472 = vmatprep.subr.bf16.mxu0 %v3364_v23  ;;  %2585 = vmatprep.subr.bf16.mxu1 %v3367_v24 }
 0x2f7   :  { %v1491_v17 = vmul.f32 %v3419_v27, %v3857_v56 }
 0x2f9   :  { %1507 = vst [vmem:[#allocation14 + $0x68] sm:$0xff] %v1491_v17  ;;  %v1516_v33 = vpack.c.bf16 %v1491_v17, %v1490_v25  ;;  %2473 = vmatpush2.bf16.msra.mxu0 %v3362_v31  ;;  %2586 = vmatpush2.bf16.msra.mxu1 %v3365_v26 }
 0x2fa   :  { %v3421_v35 = vpop.eup %3420  ;;  %2474 = vmatprep.subr.bf16.mxu0 %v3370_v28  ;;  %2587 = vmatprep.subr.bf16.mxu1 %v3373_v32 }
 0x2fb   :  { %1825 = vmatmul.mubr.bf16.gmra.mxu0 %v1516_v33  ;;  %1938 = vmatmul.mubr.bf16.gmra.mxu1 %v1516_v33  ;;  %v1492_v36 = vmul.f32 %v3421_v35, %v3862_v4  ;;  %v3382_v4 = vld [vmem:[#allocation11 + $0x94] ss:$8 sps:$4 sm:$0xff]  }
 0x2fc   :  { %1834 = vmatprep.mubr.bf16.mxu0 %v3608_v12  ;;  %1947 = vmatprep.mubr.bf16.mxu1 %v3608_v12  ;;  %v3385_v12 = vld [vmem:[#allocation11 + $0x194] ss:$8 sps:$4 sm:$0xff]  }
 0x2fd   :  { %1508 = vst [vmem:[#allocation14 + $0x70] sm:$0xff] %v1492_v36  ;;  %2475 = vmatpush2.bf16.msra.mxu0 %v3368_v41  ;;  %2588 = vmatpush2.bf16.msra.mxu1 %v3371_v34 }
 0x2fe   :  { %v3423_v56 = vpop.eup %3422  ;;  %2476 = vmatprep.subr.bf16.mxu0 %v3376_v40  ;;  %2589 = vmatprep.subr.bf16.mxu1 %v3379_v29 }
 0x2ff   :  { %v1493_v37 = vmul.f32 %v3423_v56, %v3867_v11  ;;  %v3388_v11 = vld [vmem:[#allocation11 + $0x84] ss:$8 sps:$4 sm:$0xff]  }
 0x301   :  { %1509 = vst [vmem:[#allocation14 + $0x78] sm:$0xff] %v1493_v37  ;;  %v1517_v39 = vpack.c.bf16 %v1493_v37, %v1492_v36  ;;  %2477 = vmatpush2.bf16.msra.mxu0 %v3374_v43  ;;  %2590 = vmatpush2.bf16.msra.mxu1 %v3377_v44 }
 0x302   :  { %2478 = vmatprep.subr.bf16.mxu0 %v3382_v4  ;;  %2591 = vmatprep.subr.bf16.mxu1 %v3385_v12 }
 0x303   :  { %1835 = vmatmul.mubr.bf16.gmra.mxu0 %v1517_v39  ;;  %1948 = vmatmul.mubr.bf16.gmra.mxu1 %v1517_v39 }
 0x305   :  { %2479 = vmatpush2.bf16.msra.mxu0 %v3380_v45  ;;  %2592 = vmatpush2.bf16.msra.mxu1 %v3383_v46 }
 0x306   :  { %2480 = vmatprep.subr.bf16.mxu0 %v3388_v11  ;;  %2593 = vmatprep.subr.bf16.mxu1 %v3391_v47 }
 0x309   :  { %2481 = vmatpush2.bf16.msra.mxu0 %v3386_v30  ;;  %2594 = vmatpush2.bf16.msra.mxu1 %v3389_v38 }
 0x38b   :  { %v1766_v42 = vpop.f32.mrf.mxu0  ;;  %v1879_v55 = vpop.f32.mrf.mxu1 }
 0x38c   :  { %v1767_v5 = vadd.f32 %v1766_v42, %v3912_v57  ;;  %v1880_v7 = vadd.f32 %v1879_v55, %v3916_v58 }
 0x38d   :  { %v1768_v63 = vpop.f32.mrf.mxu0  ;;  %v1881_v48 = vpop.f32.mrf.mxu1 }
 0x38e   :  { %v1769_v1 = vadd.f32 %v1768_v63, %v3905_v59  ;;  %v1882_v2 = vadd.f32 %v1881_v48, %v3909_v60  ;;  %v1958_v20 = vmax.f32 %v1767_v5, 0.0  ;;  %v1960_v19 = vmax.f32 %v1880_v7, 0.0 }
 0x38f   :  { %v1770_v61 = vpop.f32.mrf.mxu0  ;;  %v1883_v0 = vpop.f32.mrf.mxu1 }
 0x390   :  { %v1771_v3 = vadd.f32 %v1770_v61, %v3912_v57  ;;  %v1884_v51 = vadd.f32 %v1883_v0, %v3916_v58  ;;  %v1959_v15 = vmax.f32 %v1769_v1, 0.0  ;;  %v1961_v16 = vmax.f32 %v1882_v2, 0.0 }
 0x391   :  { %v1772_v9 = vpop.f32.mrf.mxu0  ;;  %v1885_v49 = vpop.f32.mrf.mxu1 }
 0x392   :  { %v1773_v53 = vadd.f32 %v1772_v9, %v3905_v59  ;;  %v1886_v10 = vadd.f32 %v1885_v49, %v3909_v60  ;;  %v1962_v8 = vmax.f32 %v1771_v3, 0.0  ;;  %v1964_v62 = vmax.f32 %v1884_v51, 0.0 }
 0x393   :  { %v1776_v13 = vpop.f32.mrf.mxu0  ;;  %v1889_v14 = vpop.f32.mrf.mxu1 }
 0x394   :  { %v1963_v18 = vmax.f32 %v1773_v53, 0.0  ;;  %v1965_v21 = vmax.f32 %v1886_v10, 0.0  ;;  %v2022_v25 = vpack.c.bf16 %v1962_v8, %v1958_v20  ;;  %v2024_v31 = vpack.c.bf16 %v1964_v62, %v1960_v19 }
 0x395   :  { %v1778_v6 = vpop.f32.mrf.mxu0  ;;  %v1891_v22 = vpop.f32.mrf.mxu1  ;;  %v1777_v41 = vadd.f32 %v1776_v13, %v3912_v57  ;;  %v1890_v34 = vadd.f32 %v1889_v14, %v3916_v58 }
 0x396   :  { %v2023_v23 = vpack.c.bf16 %v1963_v18, %v1959_v15  ;;  %v2025_v24 = vpack.c.bf16 %v1965_v21, %v1961_v16  ;;  %v1779_v26 = vadd.f32 %v1778_v6, %v3905_v59  ;;  %v1892_v32 = vadd.f32 %v1891_v22, %v3909_v60 }
 0x397   :  { %v1780_v27 = vpop.f32.mrf.mxu0  ;;  %v1893_v28 = vpop.f32.mrf.mxu1  ;;  %v1966_v46 = vmax.f32 %v1777_v41, 0.0  ;;  %v1968_v11 = vmax.f32 %v1890_v34, 0.0 }
 0x398   :  { %v1781_v17 = vadd.f32 %v1780_v27, %v3912_v57  ;;  %v1894_v33 = vadd.f32 %v1893_v28, %v3916_v58  ;;  %2482 = vmatprep.mubr.bf16.mxu0 %v2023_v23  ;;  %2595 = vmatprep.mubr.bf16.mxu1 %v2025_v24  ;;  %v1967_v44 = vmax.f32 %v1779_v26, 0.0  ;;  %v1969_v4 = vmax.f32 %v1892_v32, 0.0 }
 0x399   :  { %v1782_v35 = vpop.f32.mrf.mxu0  ;;  %v1895_v36 = vpop.f32.mrf.mxu1  ;;  %2483 = vmatmul.mubr.bf16.vlgmr.msra.gmra.mxu0 %v2022_v25  ;;  %2596 = vmatmul.mubr.bf16.vlgmr.msra.gmra.mxu1 %v2024_v31 }
 0x39a   :  { %v1783_v56 = vadd.f32 %v1782_v35, %v3905_v59  ;;  %v1896_v37 = vadd.f32 %v1895_v36, %v3909_v60  ;;  %v1970_v39 = vmax.f32 %v1781_v17, 0.0  ;;  %v1972_v40 = vmax.f32 %v1894_v33, 0.0 }
 0x39b   :  { %v1786_v29 = vpop.f32.mrf.mxu0  ;;  %v1899_v43 = vpop.f32.mrf.mxu1 }
 0x39c   :  { %v1971_v12 = vmax.f32 %v1783_v56, 0.0  ;;  %v1973_v45 = vmax.f32 %v1896_v37, 0.0  ;;  %v2026_v42 = vpack.c.bf16 %v1970_v39, %v1966_v46  ;;  %v2028_v55 = vpack.c.bf16 %v1972_v40, %v1968_v11 }
 0x39d   :  { %v1788_v47 = vpop.f32.mrf.mxu0  ;;  %v1901_v30 = vpop.f32.mrf.mxu1  ;;  %v1787_v3 = vadd.f32 %v1786_v29, %v3912_v57  ;;  %v1900_v51 = vadd.f32 %v1899_v43, %v3916_v58 }
 0x39e   :  { %v2027_v38 = vpack.c.bf16 %v1971_v12, %v1967_v44  ;;  %v2029_v54 = vpack.c.bf16 %v1973_v45, %v1969_v4  ;;  %v1789_v63 = vadd.f32 %v1788_v47, %v3905_v59  ;;  %v1902_v0 = vadd.f32 %v1901_v30, %v3909_v60 }
 0x39f   :  { %v1790_v48 = vpop.f32.mrf.mxu0  ;;  %v1903_v61 = vpop.f32.mrf.mxu1  ;;  %v1974_v18 = vmax.f32 %v1787_v3, 0.0  ;;  %v1976_v21 = vmax.f32 %v1900_v51, 0.0 }
 0x3a0   :  { %v1791_v1 = vadd.f32 %v1790_v48, %v3912_v57  ;;  %v1904_v2 = vadd.f32 %v1903_v61, %v3916_v58  ;;  %2492 = vmatprep.mubr.bf16.mxu0 %v2027_v38  ;;  %2605 = vmatprep.mubr.bf16.mxu1 %v2029_v54  ;;  %v1975_v13 = vmax.f32 %v1789_v63, 0.0  ;;  %v1977_v14 = vmax.f32 %v1902_v0, 0.0 }
 0x3a1   :  { %v1792_v5 = vpop.f32.mrf.mxu0  ;;  %v1905_v7 = vpop.f32.mrf.mxu1  ;;  %2493 = vmatmul.mubr.bf16.gmra.mxu0 %v2026_v42  ;;  %2606 = vmatmul.mubr.bf16.gmra.mxu1 %v2028_v55 }
 0x3a2   :  { %v1793_v9 = vadd.f32 %v1792_v5, %v3905_v59  ;;  %v1906_v49 = vadd.f32 %v1905_v7, %v3909_v60  ;;  %v1978_v53 = vmax.f32 %v1791_v1, 0.0  ;;  %v1980_v10 = vmax.f32 %v1904_v2, 0.0 }
 0x3a3   :  { %v1796_v8 = vpop.f32.mrf.mxu0  ;;  %v1909_v62 = vpop.f32.mrf.mxu1 }
 0x3a4   :  { %v1979_v15 = vmax.f32 %v1793_v9, 0.0  ;;  %v1981_v16 = vmax.f32 %v1906_v49, 0.0  ;;  %v2030_v23 = vpack.c.bf16 %v1978_v53, %v1974_v18  ;;  %v2032_v24 = vpack.c.bf16 %v1980_v10, %v1976_v21 }
 0x3a5   :  { %v1798_v20 = vpop.f32.mrf.mxu0  ;;  %v1911_v19 = vpop.f32.mrf.mxu1  ;;  %v1797_v17 = vadd.f32 %v1796_v8, %v3912_v57  ;;  %v1910_v33 = vadd.f32 %v1909_v62, %v3916_v58 }
 0x3a6   :  { %v2031_v6 = vpack.c.bf16 %v1979_v15, %v1975_v13  ;;  %v2033_v22 = vpack.c.bf16 %v1981_v16, %v1977_v14  ;;  %v1799_v25 = vadd.f32 %v1798_v20, %v3905_v59  ;;  %v1912_v27 = vadd.f32 %v1911_v19, %v3909_v60 }
 0x3a7   :  { %v1800_v31 = vpop.f32.mrf.mxu0  ;;  %v1913_v26 = vpop.f32.mrf.mxu1  ;;  %v1982_v12 = vmax.f32 %v1797_v17, 0.0  ;;  %v1984_v45 = vmax.f32 %v1910_v33, 0.0 }
 0x3a8   :  { %v1801_v28 = vadd.f32 %v1800_v31, %v3912_v57  ;;  %v1914_v32 = vadd.f32 %v1913_v26, %v3916_v58  ;;  %2502 = vmatprep.mubr.bf16.mxu0 %v2031_v6  ;;  %2615 = vmatprep.mubr.bf16.mxu1 %v2033_v22  ;;  %v1983_v29 = vmax.f32 %v1799_v25, 0.0  ;;  %v1985_v43 = vmax.f32 %v1912_v27, 0.0 }
 0x3a9   :  { %v1802_v41 = vpop.f32.mrf.mxu0  ;;  %v1915_v34 = vpop.f32.mrf.mxu1  ;;  %2503 = vmatmul.mubr.bf16.gmra.mxu0 %v2030_v23  ;;  %2616 = vmatmul.mubr.bf16.gmra.mxu1 %v2032_v24 }
 0x3aa   :  { %v1803_v35 = vadd.f32 %v1802_v41, %v3905_v59  ;;  %v1916_v36 = vadd.f32 %v1915_v34, %v3909_v60  ;;  %v1986_v56 = vmax.f32 %v1801_v28, 0.0  ;;  %v1988_v37 = vmax.f32 %v1914_v32, 0.0 }
 0x3ab   :  { %v1806_v39 = vpop.f32.mrf.mxu0  ;;  %v1919_v40 = vpop.f32.mrf.mxu1 }
 0x3ac   :  { %v1987_v44 = vmax.f32 %v1803_v35, 0.0  ;;  %v1989_v4 = vmax.f32 %v1916_v36, 0.0  ;;  %v2034_v38 = vpack.c.bf16 %v1986_v56, %v1982_v12  ;;  %v2036_v54 = vpack.c.bf16 %v1988_v37, %v1984_v45 }
 0x3ad   :  { %v1808_v46 = vpop.f32.mrf.mxu0  ;;  %v1921_v11 = vpop.f32.mrf.mxu1  ;;  %v1807_v1 = vadd.f32 %v1806_v39, %v3912_v57  ;;  %v1920_v2 = vadd.f32 %v1919_v40, %v3916_v58 }
 0x3ae   :  { %v2035_v47 = vpack.c.bf16 %v1987_v44, %v1983_v29  ;;  %v2037_v30 = vpack.c.bf16 %v1989_v4, %v1985_v43  ;;  %v1809_v42 = vadd.f32 %v1808_v46, %v3905_v59  ;;  %v1922_v48 = vadd.f32 %v1921_v11, %v3909_v60 }
 0x3af   :  { %v1810_v55 = vpop.f32.mrf.mxu0  ;;  %v1923_v63 = vpop.f32.mrf.mxu1  ;;  %v1990_v15 = vmax.f32 %v1807_v1, 0.0  ;;  %v1992_v16 = vmax.f32 %v1920_v2, 0.0 }
 0x3b0   :  { %v1811_v61 = vadd.f32 %v1810_v55, %v3912_v57  ;;  %v1924_v0 = vadd.f32 %v1923_v63, %v3916_v58  ;;  %2512 = vmatprep.mubr.bf16.mxu0 %v2035_v47  ;;  %2625 = vmatprep.mubr.bf16.mxu1 %v2037_v30  ;;  %v1991_v8 = vmax.f32 %v1809_v42, 0.0  ;;  %v1993_v62 = vmax.f32 %v1922_v48, 0.0 }
 0x3b1   :  { %v1812_v3 = vpop.f32.mrf.mxu0  ;;  %v1925_v51 = vpop.f32.mrf.mxu1  ;;  %2513 = vmatmul.mubr.bf16.gmra.mxu0 %v2034_v38  ;;  %2626 = vmatmul.mubr.bf16.gmra.mxu1 %v2036_v54 }
 0x3b2   :  { %v1813_v5 = vadd.f32 %v1812_v3, %v3905_v59  ;;  %v1926_v7 = vadd.f32 %v1925_v51, %v3909_v60  ;;  %v1994_v9 = vmax.f32 %v1811_v61, 0.0  ;;  %v1996_v49 = vmax.f32 %v1924_v0, 0.0 }
 0x3b3   :  { %v1816_v53 = vpop.f32.mrf.mxu0  ;;  %v1929_v10 = vpop.f32.mrf.mxu1 }
 0x3b4   :  { %v1995_v13 = vmax.f32 %v1813_v5, 0.0  ;;  %v1997_v14 = vmax.f32 %v1926_v7, 0.0  ;;  %v2038_v6 = vpack.c.bf16 %v1994_v9, %v1990_v15  ;;  %v2040_v22 = vpack.c.bf16 %v1996_v49, %v1992_v16 }
 0x3b5   :  { %v1818_v18 = vpop.f32.mrf.mxu0  ;;  %v1931_v21 = vpop.f32.mrf.mxu1  ;;  %v1817_v28 = vadd.f32 %v1816_v53, %v3912_v57  ;;  %v1930_v32 = vadd.f32 %v1929_v10, %v3916_v58 }
 0x3b6   :  { %v2039_v20 = vpack.c.bf16 %v1995_v13, %v1991_v8  ;;  %v2041_v19 = vpack.c.bf16 %v1997_v14, %v1993_v62  ;;  %v1819_v23 = vadd.f32 %v1818_v18, %v3905_v59  ;;  %v1932_v31 = vadd.f32 %v1931_v21, %v3909_v60 }
 0x3b7   :  { %v1820_v24 = vpop.f32.mrf.mxu0  ;;  %v1933_v25 = vpop.f32.mrf.mxu1  ;;  %v1998_v44 = vmax.f32 %v1817_v28, 0.0  ;;  %v2000_v4 = vmax.f32 %v1930_v32, 0.0 }
 0x3b8   :  { %v1821_v26 = vadd.f32 %v1820_v24, %v3912_v57  ;;  %v1934_v27 = vadd.f32 %v1933_v25, %v3916_v58  ;;  %2522 = vmatprep.mubr.bf16.mxu0 %v2039_v20  ;;  %2635 = vmatprep.mubr.bf16.mxu1 %v2041_v19  ;;  %v1999_v39 = vmax.f32 %v1819_v23, 0.0  ;;  %v2001_v40 = vmax.f32 %v1932_v31, 0.0 }
 0x3b9   :  { %v1822_v17 = vpop.f32.mrf.mxu0  ;;  %v1935_v33 = vpop.f32.mrf.mxu1  ;;  %2523 = vmatmul.mubr.bf16.gmra.mxu0 %v2038_v6  ;;  %2636 = vmatmul.mubr.bf16.gmra.mxu1 %v2040_v22 }
 0x3ba   :  { %v1823_v41 = vadd.f32 %v1822_v17, %v3905_v59  ;;  %v1936_v34 = vadd.f32 %v1935_v33, %v3909_v60  ;;  %v2002_v35 = vmax.f32 %v1821_v26, 0.0  ;;  %v2004_v36 = vmax.f32 %v1934_v27, 0.0 }
 0x3bb   :  { %v1826_v56 = vpop.f32.mrf.mxu0  ;;  %v1939_v37 = vpop.f32.mrf.mxu1 }
 0x3bc   :  { %v2003_v29 = vmax.f32 %v1823_v41, 0.0  ;;  %v2005_v43 = vmax.f32 %v1936_v34, 0.0  ;;  %v2042_v47 = vpack.c.bf16 %v2002_v35, %v1998_v44  ;;  %v2044_v30 = vpack.c.bf16 %v2004_v36, %v2000_v4 }
 0x3bd   :  { %v1828_v12 = vpop.f32.mrf.mxu0  ;;  %v1941_v45 = vpop.f32.mrf.mxu1  ;;  %v1827_v61 = vadd.f32 %v1826_v56, %v3912_v57  ;;  %v1940_v0 = vadd.f32 %v1939_v37, %v3916_v58 }
 0x3be   :  { %v2043_v46 = vpack.c.bf16 %v2003_v29, %v1999_v39  ;;  %v2045_v11 = vpack.c.bf16 %v2005_v43, %v2001_v40  ;;  %v1829_v38 = vadd.f32 %v1828_v12, %v3905_v59  ;;  %v1942_v55 = vadd.f32 %v1941_v45, %v3909_v60 }
 0x3bf   :  { %v1830_v54 = vpop.f32.mrf.mxu0  ;;  %v1943_v42 = vpop.f32.mrf.mxu1  ;;  %v2006_v13 = vmax.f32 %v1827_v61, 0.0  ;;  %v2008_v14 = vmax.f32 %v1940_v0, 0.0 }
 0x3c0   :  { %v1831_v63 = vadd.f32 %v1830_v54, %v3912_v57  ;;  %v1944_v48 = vadd.f32 %v1943_v42, %v3916_v58  ;;  %2532 = vmatprep.mubr.bf16.mxu0 %v2043_v46  ;;  %2645 = vmatprep.mubr.bf16.mxu1 %v2045_v11  ;;  %v2007_v53 = vmax.f32 %v1829_v38, 0.0  ;;  %v2009_v10 = vmax.f32 %v1942_v55, 0.0 }
 0x3c1   :  { %v1832_v1 = vpop.f32.mrf.mxu0  ;;  %v1945_v2 = vpop.f32.mrf.mxu1  ;;  %2533 = vmatmul.mubr.bf16.gmra.mxu0 %v2042_v47  ;;  %2646 = vmatmul.mubr.bf16.gmra.mxu1 %v2044_v30 }
 0x3c2   :  { %v1833_v3 = vadd.f32 %v1832_v1, %v3905_v59  ;;  %v1946_v51 = vadd.f32 %v1945_v2, %v3909_v60  ;;  %v2010_v5 = vmax.f32 %v1831_v63, 0.0  ;;  %v2012_v7 = vmax.f32 %v1944_v48, 0.0 }
 0x3c3   :  { %v1836_v9 = vpop.f32.mrf.mxu0  ;;  %v1949_v49 = vpop.f32.mrf.mxu1 }
 0x3c4   :  { %v2011_v8 = vmax.f32 %v1833_v3, 0.0  ;;  %v2013_v62 = vmax.f32 %v1946_v51, 0.0  ;;  %v2046_v20 = vpack.c.bf16 %v2010_v5, %v2006_v13  ;;  %v2048_v19 = vpack.c.bf16 %v2012_v7, %v2008_v14 }
 0x3c5   :  { %v1838_v15 = vpop.f32.mrf.mxu0  ;;  %v1951_v16 = vpop.f32.mrf.mxu1  ;;  %v1837_v26 = vadd.f32 %v1836_v9, %v3912_v57  ;;  %v1950_v27 = vadd.f32 %v1949_v49, %v3916_v58 }
 0x3c6   :  { %v2047_v18 = vpack.c.bf16 %v2011_v8, %v2007_v53  ;;  %v2049_v21 = vpack.c.bf16 %v2013_v62, %v2009_v10  ;;  %v1839_v6 = vadd.f32 %v1838_v15, %v3905_v59  ;;  %v1952_v24 = vadd.f32 %v1951_v16, %v3909_v60 }
 0x3c7   :  { %v1840_v22 = vpop.f32.mrf.mxu0  ;;  %v1953_v23 = vpop.f32.mrf.mxu1  ;;  %v2014_v39 = vmax.f32 %v1837_v26, 0.0  ;;  %v2016_v40 = vmax.f32 %v1950_v27, 0.0 }
 0x3c8   :  { %v1841_v25 = vadd.f32 %v1840_v22, %v3912_v57  ;;  %v1954_v31 = vadd.f32 %v1953_v23, %v3916_v58  ;;  %2542 = vmatprep.mubr.bf16.mxu0 %v2047_v18  ;;  %2655 = vmatprep.mubr.bf16.mxu1 %v2049_v21  ;;  %v2015_v35 = vmax.f32 %v1839_v6, 0.0  ;;  %v2017_v36 = vmax.f32 %v1952_v24, 0.0 }
 0x3c9   :  { %v1842_v28 = vpop.f32.mrf.mxu0  ;;  %v1955_v32 = vpop.f32.mrf.mxu1  ;;  %2543 = vmatmul.mubr.bf16.gmra.mxu0 %v2046_v20  ;;  %2656 = vmatmul.mubr.bf16.gmra.mxu1 %v2048_v19 }
 0x3ca   :  { %v1843_v17 = vadd.f32 %v1842_v28, %v3905_v59  ;;  %v1956_v33 = vadd.f32 %v1955_v32, %v3909_v60  ;;  %v2018_v41 = vmax.f32 %v1841_v25, 0.0  ;;  %v2020_v34 = vmax.f32 %v1954_v31, 0.0 }
 0x3cc   :  { %v2019_v56 = vmax.f32 %v1843_v17, 0.0  ;;  %v2021_v37 = vmax.f32 %v1956_v33, 0.0  ;;  %v2050_v43 = vpack.c.bf16 %v2018_v41, %v2014_v39  ;;  %v2052_v58 = vpack.c.bf16 %v2020_v34, %v2016_v40 }
 0x3ce   :  { %v2051_v29 = vpack.c.bf16 %v2019_v56, %v2015_v35  ;;  %v2053_v57 = vpack.c.bf16 %v2021_v37, %v2017_v36 }
 0x3d0   :  { %2552 = vmatprep.mubr.bf16.mxu0 %v2051_v29  ;;  %2665 = vmatprep.mubr.bf16.mxu1 %v2053_v57 }
 0x3d1   :  { %2553 = vmatmul.mubr.bf16.gmra.mxu0 %v2050_v43  ;;  %2666 = vmatmul.mubr.bf16.gmra.mxu1 %v2052_v58 }
 0x3d2   :  { %3555 = shalt.err (!%p3552_p6)
}
 0x3d3   :  { %2731 = dma.vmem_to_hbm [thread:$0]  %s2726_s28, 2048, %s4045_s10, [#allocation15], %s3603_s29, %s3603_s29, %s3604_s30  }
 0x3d4   :  { %v2118_v59 = vld [vmem:[%s4043_s8] sm:$0x3]  ;;  %s3610_s8 = smov [#allocation13]  }
 0x3d5   :  { %v3992_v60 = vrot.slane %v2118_v59, %v3703_v52  ;;  %v3995_v44 = vrot.slane %v2118_v59, %v3699_v50  ;;  %s2713_s10 = sshll.u32 %s3610_s8, 4  ;;  %s2714_s10 = int_to_ptr.vmem [resolvable:$true] %s2713_s10 }
 0x3d6   :  { %s3564_s29 = scalar_lea.vmem %s2714_s10, 4096  ;;  %p3569_p8 = scmp.lt.s32.totalorder %s2714_s10, %s2714_s10 }
 0x3d7   :  { %p3565_p7 = scmp.ne.s32.totalorder %s2714_s10, %s3564_s29  ;;  %p3570_p9 = scmp.lt.s32.totalorder %s3564_s29, %s3564_s29 }
 0x3d9   :  { %p3571_p10 = por %p3570_p9, %p3569_p8 }
 0x3db   :  { %p3572_p11 = pnand %p3571_p10, %p3565_p7 }
 0x459   :  { %v2484_v4 = vpop.f32.mrf.mxu0  ;;  %v2597_v12 = vpop.f32.mrf.mxu1 }
 0x45a   :  { %v2485_v45 = vadd.f32 %v2484_v4, %v3992_v60 }
 0x45b   :  { %v2486_v46 = vpop.f32.mrf.mxu0  ;;  %v2599_v11 = vpop.f32.mrf.mxu1 }
 0x45c   :  { %v2598_v47 = vadd.f32 %v2597_v12, %v2485_v45  ;;  %v2487_v30 = vadd.f32 %v2486_v46, %v3995_v44 }
 0x45d   :  { %v2488_v38 = vpop.f32.mrf.mxu0  ;;  %v2601_v54 = vpop.f32.mrf.mxu1 }
 0x45e   :  { %2676 = vst [vmem:[#allocation13] sm:$0xff] %v2598_v47  ;;  %v2600_v42 = vadd.f32 %v2599_v11, %v2487_v30  ;;  %v2489_v55 = vadd.f32 %v2488_v38, %v3992_v60 }
 0x45f   :  { %v2490_v52 = vpop.f32.mrf.mxu0  ;;  %v2603_v63 = vpop.f32.mrf.mxu1 }
 0x460   :  { %2677 = vst [vmem:[#allocation13 + $0x8] sm:$0xff] %v2600_v42  ;;  %v2602_v50 = vadd.f32 %v2601_v54, %v2489_v55  ;;  %v2491_v48 = vadd.f32 %v2490_v52, %v3995_v44 }
 0x461   :  { %v2494_v61 = vpop.f32.mrf.mxu0  ;;  %v2607_v0 = vpop.f32.mrf.mxu1 }
 0x462   :  { %2678 = vst [vmem:[#allocation13 + $0x10] sm:$0xff] %v2602_v50  ;;  %v2604_v1 = vadd.f32 %v2603_v63, %v2491_v48  ;;  %v2495_v2 = vadd.f32 %v2494_v61, %v3992_v60 }
 0x463   :  { %v2496_v3 = vpop.f32.mrf.mxu0  ;;  %v2609_v51 = vpop.f32.mrf.mxu1 }
 0x464   :  { %2679 = vst [vmem:[#allocation13 + $0x18] sm:$0xff] %v2604_v1  ;;  %v2608_v5 = vadd.f32 %v2607_v0, %v2495_v2  ;;  %v2497_v7 = vadd.f32 %v2496_v3, %v3995_v44 }
 0x465   :  { %v2498_v9 = vpop.f32.mrf.mxu0  ;;  %v2611_v49 = vpop.f32.mrf.mxu1 }
 0x466   :  { %2680 = vst [vmem:[#allocation13 + $0x20] sm:$0xff] %v2608_v5  ;;  %v2610_v53 = vadd.f32 %v2609_v51, %v2497_v7  ;;  %v2499_v10 = vadd.f32 %v2498_v9, %v3992_v60 }
 0x467   :  { %v2500_v8 = vpop.f32.mrf.mxu0  ;;  %v2613_v62 = vpop.f32.mrf.mxu1 }
 0x468   :  { %2681 = vst [vmem:[#allocation13 + $0x28] sm:$0xff] %v2610_v53  ;;  %v2612_v13 = vadd.f32 %v2611_v49, %v2499_v10  ;;  %v2501_v14 = vadd.f32 %v2500_v8, %v3995_v44 }
 0x469   :  { %v2504_v15 = vpop.f32.mrf.mxu0  ;;  %v2617_v16 = vpop.f32.mrf.mxu1 }
 0x46a   :  { %2682 = vst [vmem:[#allocation13 + $0x30] sm:$0xff] %v2612_v13  ;;  %v2614_v18 = vadd.f32 %v2613_v62, %v2501_v14  ;;  %v2505_v21 = vadd.f32 %v2504_v15, %v3992_v60 }
 0x46b   :  { %v2506_v20 = vpop.f32.mrf.mxu0  ;;  %v2619_v19 = vpop.f32.mrf.mxu1 }
 0x46c   :  { %2683 = vst [vmem:[#allocation13 + $0x38] sm:$0xff] %v2614_v18  ;;  %v2618_v6 = vadd.f32 %v2617_v16, %v2505_v21  ;;  %v2507_v22 = vadd.f32 %v2506_v20, %v3995_v44 }
 0x46d   :  { %v2508_v23 = vpop.f32.mrf.mxu0  ;;  %v2621_v24 = vpop.f32.mrf.mxu1 }
 0x46e   :  { %2684 = vst [vmem:[#allocation13 + $0x40] sm:$0xff] %v2618_v6  ;;  %v2620_v25 = vadd.f32 %v2619_v19, %v2507_v22  ;;  %v2509_v31 = vadd.f32 %v2508_v23, %v3992_v60 }
 0x46f   :  { %v2510_v26 = vpop.f32.mrf.mxu0  ;;  %v2623_v27 = vpop.f32.mrf.mxu1 }
 0x470   :  { %2685 = vst [vmem:[#allocation13 + $0x48] sm:$0xff] %v2620_v25  ;;  %v2622_v28 = vadd.f32 %v2621_v24, %v2509_v31  ;;  %v2511_v32 = vadd.f32 %v2510_v26, %v3995_v44 }
 0x471   :  { %v2514_v17 = vpop.f32.mrf.mxu0  ;;  %v2627_v33 = vpop.f32.mrf.mxu1 }
 0x472   :  { %2686 = vst [vmem:[#allocation13 + $0x50] sm:$0xff] %v2622_v28  ;;  %v2624_v41 = vadd.f32 %v2623_v27, %v2511_v32  ;;  %v2515_v34 = vadd.f32 %v2514_v17, %v3992_v60 }
 0x473   :  { %v2516_v35 = vpop.f32.mrf.mxu0  ;;  %v2629_v36 = vpop.f32.mrf.mxu1 }
 0x474   :  { %2687 = vst [vmem:[#allocation13 + $0x58] sm:$0xff] %v2624_v41  ;;  %v2628_v56 = vadd.f32 %v2627_v33, %v2515_v34  ;;  %v2517_v37 = vadd.f32 %v2516_v35, %v3995_v44 }
 0x475   :  { %v2518_v39 = vpop.f32.mrf.mxu0  ;;  %v2631_v40 = vpop.f32.mrf.mxu1 }
 0x476   :  { %2688 = vst [vmem:[#allocation13 + $0x60] sm:$0xff] %v2628_v56  ;;  %v2630_v29 = vadd.f32 %v2629_v36, %v2517_v37  ;;  %v2519_v57 = vadd.f32 %v2518_v39, %v3992_v60 }
 0x477   :  { %v2520_v43 = vpop.f32.mrf.mxu0  ;;  %v2633_v58 = vpop.f32.mrf.mxu1 }
 0x478   :  { %2689 = vst [vmem:[#allocation13 + $0x68] sm:$0xff] %v2630_v29  ;;  %v2632_v59 = vadd.f32 %v2631_v40, %v2519_v57  ;;  %v2521_v4 = vadd.f32 %v2520_v43, %v3995_v44 }
 0x479   :  { %v2524_v12 = vpop.f32.mrf.mxu0  ;;  %v2637_v45 = vpop.f32.mrf.mxu1 }
 0x47a   :  { %2690 = vst [vmem:[#allocation13 + $0x70] sm:$0xff] %v2632_v59  ;;  %v2634_v46 = vadd.f32 %v2633_v58, %v2521_v4  ;;  %v2525_v11 = vadd.f32 %v2524_v12, %v3992_v60 }
 0x47b   :  { %v2526_v47 = vpop.f32.mrf.mxu0  ;;  %v2639_v30 = vpop.f32.mrf.mxu1 }
 0x47c   :  { %2691 = vst [vmem:[#allocation13 + $0x78] sm:$0xff] %v2634_v46  ;;  %v2638_v38 = vadd.f32 %v2637_v45, %v2525_v11  ;;  %v2527_v54 = vadd.f32 %v2526_v47, %v3995_v44 }
 0x47d   :  { %v2528_v42 = vpop.f32.mrf.mxu0  ;;  %v2641_v55 = vpop.f32.mrf.mxu1 }
 0x47e   :  { %2692 = vst [vmem:[#allocation13 + $0x80] sm:$0xff] %v2638_v38  ;;  %v2640_v52 = vadd.f32 %v2639_v30, %v2527_v54  ;;  %v2529_v63 = vadd.f32 %v2528_v42, %v3992_v60 }
 0x47f   :  { %v2530_v50 = vpop.f32.mrf.mxu0  ;;  %v2643_v48 = vpop.f32.mrf.mxu1 }
 0x480   :  { %2693 = vst [vmem:[#allocation13 + $0x88] sm:$0xff] %v2640_v52  ;;  %v2642_v61 = vadd.f32 %v2641_v55, %v2529_v63  ;;  %v2531_v0 = vadd.f32 %v2530_v50, %v3995_v44 }
 0x481   :  { %v2534_v1 = vpop.f32.mrf.mxu0  ;;  %v2647_v2 = vpop.f32.mrf.mxu1 }
 0x482   :  { %2694 = vst [vmem:[#allocation13 + $0x90] sm:$0xff] %v2642_v61  ;;  %v2644_v3 = vadd.f32 %v2643_v48, %v2531_v0  ;;  %v2535_v51 = vadd.f32 %v2534_v1, %v3992_v60 }
 0x483   :  { %v2536_v5 = vpop.f32.mrf.mxu0  ;;  %v2649_v7 = vpop.f32.mrf.mxu1 }
 0x484   :  { %2695 = vst [vmem:[#allocation13 + $0x98] sm:$0xff] %v2644_v3  ;;  %v2648_v9 = vadd.f32 %v2647_v2, %v2535_v51  ;;  %v2537_v49 = vadd.f32 %v2536_v5, %v3995_v44 }
 0x485   :  { %v2538_v53 = vpop.f32.mrf.mxu0  ;;  %v2651_v10 = vpop.f32.mrf.mxu1 }
 0x486   :  { %2696 = vst [vmem:[#allocation13 + $0xa0] sm:$0xff] %v2648_v9  ;;  %v2650_v8 = vadd.f32 %v2649_v7, %v2537_v49  ;;  %v2539_v62 = vadd.f32 %v2538_v53, %v3992_v60 }
 0x487   :  { %v2540_v13 = vpop.f32.mrf.mxu0  ;;  %v2653_v14 = vpop.f32.mrf.mxu1 }
 0x488   :  { %2697 = vst [vmem:[#allocation13 + $0xa8] sm:$0xff] %v2650_v8  ;;  %v2652_v15 = vadd.f32 %v2651_v10, %v2539_v62  ;;  %v2541_v16 = vadd.f32 %v2540_v13, %v3995_v44 }
 0x489   :  { %v2544_v18 = vpop.f32.mrf.mxu0  ;;  %v2657_v21 = vpop.f32.mrf.mxu1 }
 0x48a   :  { %2698 = vst [vmem:[#allocation13 + $0xb0] sm:$0xff] %v2652_v15  ;;  %v2654_v20 = vadd.f32 %v2653_v14, %v2541_v16  ;;  %v2545_v19 = vadd.f32 %v2544_v18, %v3992_v60 }
 0x48b   :  { %v2546_v6 = vpop.f32.mrf.mxu0  ;;  %v2659_v22 = vpop.f32.mrf.mxu1 }
 0x48c   :  { %2699 = vst [vmem:[#allocation13 + $0xb8] sm:$0xff] %v2654_v20  ;;  %v2658_v23 = vadd.f32 %v2657_v21, %v2545_v19  ;;  %v2547_v24 = vadd.f32 %v2546_v6, %v3995_v44 }
 0x48d   :  { %v2548_v25 = vpop.f32.mrf.mxu0  ;;  %v2661_v31 = vpop.f32.mrf.mxu1 }
 0x48e   :  { %2700 = vst [vmem:[#allocation13 + $0xc0] sm:$0xff] %v2658_v23  ;;  %v2660_v26 = vadd.f32 %v2659_v22, %v2547_v24  ;;  %v2549_v27 = vadd.f32 %v2548_v25, %v3992_v60 }
 0x48f   :  { %v2550_v28 = vpop.f32.mrf.mxu0  ;;  %v2663_v32 = vpop.f32.mrf.mxu1 }
 0x490   :  { %2701 = vst [vmem:[#allocation13 + $0xc8] sm:$0xff] %v2660_v26  ;;  %v2662_v17 = vadd.f32 %v2661_v31, %v2549_v27  ;;  %v2551_v33 = vadd.f32 %v2550_v28, %v3995_v44 }
 0x491   :  { %v2554_v41 = vpop.f32.mrf.mxu0  ;;  %v2667_v34 = vpop.f32.mrf.mxu1 }
 0x492   :  { %2702 = vst [vmem:[#allocation13 + $0xd0] sm:$0xff] %v2662_v17  ;;  %v2664_v35 = vadd.f32 %v2663_v32, %v2551_v33  ;;  %v2555_v36 = vadd.f32 %v2554_v41, %v3992_v60 }
 0x493   :  { %v2556_v56 = vpop.f32.mrf.mxu0  ;;  %v2669_v37 = vpop.f32.mrf.mxu1 }
 0x494   :  { %2703 = vst [vmem:[#allocation13 + $0xd8] sm:$0xff] %v2664_v35  ;;  %v2668_v39 = vadd.f32 %v2667_v34, %v2555_v36  ;;  %v2557_v40 = vadd.f32 %v2556_v56, %v3995_v44 }
 0x495   :  { %v2558_v29 = vpop.f32.mrf.mxu0  ;;  %v2671_v57 = vpop.f32.mrf.mxu1 }
 0x496   :  { %2704 = vst [vmem:[#allocation13 + $0xe0] sm:$0xff] %v2668_v39  ;;  %v2670_v43 = vadd.f32 %v2669_v37, %v2557_v40  ;;  %v2559_v58 = vadd.f32 %v2558_v29, %v3992_v60 }
 0x497   :  { %v2560_v59 = vpop.f32.mrf.mxu0  ;;  %v2673_v45 = vpop.f32.mrf.mxu1 }
 0x498   :  { %2705 = vst [vmem:[#allocation13 + $0xe8] sm:$0xff] %v2670_v43  ;;  %v2672_v4 = vadd.f32 %v2671_v57, %v2559_v58  ;;  %v2561_v12 = vadd.f32 %v2560_v59, %v3995_v44 }
 0x49a   :  { %2706 = vst [vmem:[#allocation13 + $0xf0] sm:$0xff] %v2672_v4  ;;  %v2674_v46 = vadd.f32 %v2673_v45, %v2561_v12 }
 0x49c   :  { %2707 = vst [vmem:[#allocation13 + $0xf8] sm:$0xff] %v2674_v46 }
 0x49d   :  { %3575 = shalt.err (!%p3572_p11)
}
 0x49e   :  { %2719 = dma.vmem_to_hbm [thread:$0]  %s2714_s10, 4096, %s4044_s9, [#allocation4], %s3597_s16, %s3597_s16, %s3598_s17  }
 0x49f   :  { %3592 = dma.done.wait [#allocation4], 4096  }
 0x4a0   :  { %3593 = vsyncadd [#allocation4], 4294963200 }
 0x4a1   :  { %3594 = dma.done.wait [#allocation15], 2048  }
 0x4a2   :  { %3595 = vsyncadd [#allocation15], 4294965248 }
 0x4a3   :  { %2738 = vsyncpa [#allocation3], 1 }
 0x4a4   :  { %2739 = vsyncpa [#allocation6], 1 }
 0x4a5   :  { %2740 = vsyncpa [#allocation9], 1 }
 0x4a6   :  { %2741 = vsyncpa [#allocation12], 1 }
 0x4a7   :  { %2742 = vsyncpa [#allocation4], 1 }
 0x4a8   :  { %2743 = vsyncpa [#allocation15], 1 }

</bundles_post_ra>
